<compile_context>
chip_gen: v5e
topology: v5e:2x2
jax: 0.10.0
libtpu: 0.0.40
codegen_flags: <defaults>
</compile_context>

<pallas_src>
import functools
import math

import jax
import jax.numpy as jnp
from jax.experimental import pallas as pl
from jax.experimental.pallas import tpu as pltpu


# ------------------------------ in-kernel math ------------------------------

def _gelu_tanh(x):
    # TODO(synk): PyTorch nn.GELU default is exact (erf); the tanh
    # approximation is used for robust in-kernel TPU lowering (EUP tanh).
    return 0.5 * x * (
        1.0 + jnp.tanh(0.7978845608028654 * (x + 0.044715 * x * x * x)))


def _layernorm(x, g, b, eps):
    mu = jnp.mean(x, axis=-1, keepdims=True)
    xc = x - mu
    var = jnp.mean(xc * xc, axis=-1, keepdims=True)
    return xc * jax.lax.rsqrt(var + eps) * g + b


# Row indices inside the packed 1-D parameter slab.
(_V_B1, _V_BQKV, _V_LN1G, _V_LN1B, _V_BPROJ,
 _V_LN2G, _V_LN2B, _V_B2, _V_LNFG, _V_LNFB) = range(10)
_NVEC = 10


# ------------------------------ fused kernel --------------------------------

def _fused_vit_kernel(patches_ref, tok_bias_ref, wpe_ref, wqkv_ref, wproj_ref,
                      w1_ref, w2_ref, vec_ref, out_ref, qkv_ref,
                      *, B, S, D, Hm, heads, eps):
    """Whole batch in one body; everything stays in VMEM / vregs."""
    Dh = D // heads

    def vec(row, width):                      # packed 1-D params, single DMA
        return vec_ref[row:row + 1, 0:width]  # [1, width] f32

    b1, bqkv = vec(_V_B1, Hm), vec(_V_BQKV, 3 * D)
    ln1_g, ln1_b = vec(_V_LN1G, D), vec(_V_LN1B, D)
    bproj = vec(_V_BPROJ, D)
    ln2_g, ln2_b = vec(_V_LN2G, D), vec(_V_LN2B, D)
    b2 = vec(_V_B2, D)
    lnf_g, lnf_b = vec(_V_LNFG, D), vec(_V_LNFB, D)

    # Patch embedding (== Conv2d with kernel=stride=patch). The CLS rows of
    # the patches block are all-zero, so their matmul output is 0.
    pe = jnp.dot(patches_ref[...], wpe_ref[...],
                 preferred_element_type=jnp.float32)            # [B*S, D] f32
    # pos-embed + {CLS token | conv bias}, pre-folded on the host.
    tok = pe + tok_bias_ref[...]

    # ---- attention (pre-norm) ----
    h1 = _layernorm(tok, ln1_g, ln1_b, eps)
    qkv = jnp.dot(h1.astype(jnp.bfloat16), wqkv_ref[...],
                  preferred_element_type=jnp.float32) + bqkv    # [B*S, 3D]
    # Scratch so per-(b,h) tiles are Ref offset loads, not vreg lane slices.
    qkv_ref[...] = qkv.astype(jnp.bfloat16)

    # Per-(batch, head) attention, unrolled -> 8 independent softmax chains.
    # Output projection folded per head:
    #   concat_h(o_h) @ Wproj == sum_h o_h @ Wproj[h*Dh:(h+1)*Dh, :].
    # The 1/sqrt(Dh) scale is already folded into the Q columns of Wqkv.
    attn_rows = []
    for b in range(B):
        r0 = b * S
        acc = None
        for hd in range(heads):
            q = qkv_ref[r0:r0 + S, hd * Dh:(hd + 1) * Dh]               # bf16
            k = qkv_ref[r0:r0 + S, D + hd * Dh:D + (hd + 1) * Dh]
            v = qkv_ref[r0:r0 + S, 2 * D + hd * Dh:2 * D + (hd + 1) * Dh]
            s = jax.lax.dot_general(q, k, (((1,), (1,)), ((), ())),
                                    preferred_element_type=jnp.float32)  # [S,S]
            s = s - jnp.max(s, axis=-1, keepdims=True)
            p = jnp.exp(s)
            p = p * pl.reciprocal(jnp.sum(p, axis=-1, keepdims=True),
                                  approx=True)
            o = jnp.dot(p.astype(jnp.bfloat16), v,
                        preferred_element_type=jnp.float32)              # [S,Dh]
            ph = jnp.dot(o.astype(jnp.bfloat16),
                         wproj_ref[hd * Dh:(hd + 1) * Dh, :],
                         preferred_element_type=jnp.float32)             # [S,D]
            acc = ph if acc is None else acc + ph
        attn_rows.append(acc)
    tok = tok + jnp.concatenate(attn_rows, axis=0) + bproj      # residual 1

    # ---- MLP (pre-norm) ----
    h2 = _layernorm(tok, ln2_g, ln2_b, eps)
    m = jnp.dot(h2.astype(jnp.bfloat16), w1_ref[...],
                preferred_element_type=jnp.float32) + b1
    m = _gelu_tanh(m)
    m = jnp.dot(m.astype(jnp.bfloat16), w2_ref[...],
                preferred_element_type=jnp.float32) + b2
    tok = tok + m                                               # residual 2

    # Final LayerNorm on the CLS rows only; single store of the full output.
    cls_tok = jnp.concatenate([tok[b * S:b * S + 1, :] for b in range(B)],
                              axis=0)                           # [B, D]
    out = _layernorm(cls_tok, lnf_g, lnf_b, eps)
    out_ref[...] = out.astype(out_ref.dtype)


# ------------------------------ model wrapper --------------------------------

def init_params(key, *, in_chans=3, img=16, patch=8, dim=32, heads=4,
                mlp_ratio=4):
    n_patches = (img // patch) ** 2
    seq = n_patches + 1
    mlp_hidden = dim * mlp_ratio
    ks = jax.random.split(key, 10)
    s = 0.02

    def nrm(k, shape):
        return (s * jax.random.normal(k, shape)).astype(jnp.float32)

    return dict(
        # Conv2d patch embed, weight [D, C, p, p] flattened to [C*p*p, D].
        Wpe=nrm(ks[0], (in_chans * patch * patch, dim)),
        bpe=jnp.zeros((dim,), jnp.float32),
        cls=nrm(ks[1], (1, 1, dim)),
        pos=nrm(ks[2], (1, seq, dim)),
        ln1_g=jnp.ones((dim,), jnp.float32), ln1_b=jnp.zeros((dim,), jnp.float32),
        Wqkv=nrm(ks[3], (dim, 3 * dim)), bqkv=jnp.zeros((3 * dim,), jnp.float32),
        Wproj=nrm(ks[4], (dim, dim)), bproj=jnp.zeros((dim,), jnp.float32),
        ln2_g=jnp.ones((dim,), jnp.float32), ln2_b=jnp.zeros((dim,), jnp.float32),
        W1=nrm(ks[5], (dim, mlp_hidden)), b1=jnp.zeros((mlp_hidden,), jnp.float32),
        W2=nrm(ks[6], (mlp_hidden, dim)), b2=jnp.zeros((dim,), jnp.float32),
        lnf_g=jnp.ones((dim,), jnp.float32), lnf_b=jnp.zeros((dim,), jnp.float32),
    )


def xyz_model_forward(params, x, *, patch, heads):
    """Forward pass of xyz_model (wrapped DINO-style ViT). x: NCHW float32."""
    B, C, H, W = x.shape
    D = params["Wqkv"].shape[0]
    Hm = params["W1"].shape[1]
    gh, gw = H // patch, W // patch
    N = gh * gw
    S = N + 1
    Cpp = C * patch * patch
    Dh = D // heads
    VW = max(Hm, 3 * D, D)

    # Patch extraction glue (matches Conv2d weight flattening order C, ph, pw),
    # plus a zero row at sequence position 0 of every image (CLS placeholder).
    patches = (x.reshape(B, C, gh, patch, gw, patch)
                 .transpose(0, 2, 4, 1, 3, 5)
                 .reshape(B, N, Cpp))
    patches = jnp.concatenate(
        [jnp.zeros((B, 1, Cpp), patches.dtype), patches], axis=1)
    # TODO(synk): bf16 MXU operands trade ~1e-2-level relative error for ~3x
    # lower MXU latency; keep f32 if bit-parity with the torch model matters.
    patches = patches.reshape(B * S, Cpp).astype(jnp.bfloat16)

    # Constant additive term pre-folded on host: pos + {CLS token | conv bias}.
    pos = params["pos"].reshape(S, D)
    cls = params["cls"].reshape(1, D)
    bias_single = jnp.concatenate(
        [pos[0:1] + cls, pos[1:] + params["bpe"][None, :]], axis=0)  # [S, D]
    tok_bias = jnp.tile(bias_single, (B, 1))                         # [B*S, D]

    # Fold the 1/sqrt(Dh) attention scale into the Q columns of Wqkv / bqkv.
    qscale = jnp.concatenate(
        [jnp.full((D,), 1.0 / math.sqrt(Dh), jnp.float32),
         jnp.ones((2 * D,), jnp.float32)])
    wqkv = (params["Wqkv"] * qscale[None, :]).astype(jnp.bfloat16)
    bqkv = params["bqkv"] * qscale

    # Pack all 1-D parameters into one [NVEC, VW] slab -> a single operand/DMA.
    def pad(v):
        return jnp.pad(v, (0, VW - v.shape[0]))

    vecs = jnp.stack(
        [pad(params["b1"]), pad(bqkv),
         pad(params["ln1_g"]), pad(params["ln1_b"]),
         pad(params["bproj"]),
         pad(params["ln2_g"]), pad(params["ln2_b"]),
         pad(params["b2"]),
         pad(params["lnf_g"]), pad(params["lnf_b"])], axis=0).astype(jnp.float32)

    const = lambda i: (0, 0)

    out = pl.pallas_call(
        functools.partial(_fused_vit_kernel, B=B, S=S, D=D, Hm=Hm,
                          heads=heads, eps=1e-6),
        out_shape=jax.ShapeDtypeStruct((B, D), jnp.float32),
        grid=(1,),
        in_specs=[
            pl.BlockSpec((B * S, Cpp), const),   # patches (bf16)
            pl.BlockSpec((B * S, D), const),     # tok_bias (f32)
            pl.BlockSpec((Cpp, D), const),       # Wpe (bf16)
            pl.BlockSpec((D, 3 * D), const),     # Wqkv, Q pre-scaled (bf16)
            pl.BlockSpec((D, D), const),         # Wproj (bf16)
            pl.BlockSpec((D, Hm), const),        # W1 (bf16)
            pl.BlockSpec((Hm, D), const),        # W2 (bf16)
            pl.BlockSpec((_NVEC, VW), const),    # packed 1-D params (f32)
        ],
        out_specs=pl.BlockSpec((B, D), const),
        scratch_shapes=[pltpu.VMEM((B * S, 3 * D), jnp.bfloat16)],
    )(patches, tok_bias,
      params["Wpe"].astype(jnp.bfloat16), wqkv,
      params["Wproj"].astype(jnp.bfloat16),
      params["W1"].astype(jnp.bfloat16), params["W2"].astype(jnp.bfloat16),
      vecs)

    return out.astype(x.dtype)                                   # [B, D] CLS


# --------------------------------- main --------------------------------------

if __name__ == "__main__":
    key = jax.random.PRNGKey(0)
    k_param, k_input = jax.random.split(key)

    params = init_params(k_param, in_chans=3, img=16, patch=8,
                         dim=32, heads=4, mlp_ratio=4)

    x = jax.random.normal(k_input, (2, 3, 16, 16), dtype=jnp.float32)  # NCHW

    fwd = jax.jit(functools.partial(xyz_model_forward, patch=8, heads=4))
    out = jax.block_until_ready(fwd(params, x))

    assert out.shape == (2, 32), out.shape
    assert bool(jnp.all(jnp.isfinite(out)))
    print("KERNEL_OK")
</pallas_src>

<mosaic_0001>
module attributes {stable_mosaic.version = 11 : i64} {
  func.func @_fused_vit_kernel(%arg0: i32, %arg1: memref<10x192xbf16, #tpu.memory_space<vmem>>, %arg2: memref<10x32xf32, #tpu.memory_space<vmem>>, %arg3: memref<192x32xbf16, #tpu.memory_space<vmem>>, %arg4: memref<32x96xbf16, #tpu.memory_space<vmem>>, %arg5: memref<32x32xbf16, #tpu.memory_space<vmem>>, %arg6: memref<32x128xbf16, #tpu.memory_space<vmem>>, %arg7: memref<128x32xbf16, #tpu.memory_space<vmem>>, %arg8: memref<10x128xf32, #tpu.memory_space<vmem>>, %arg9: memref<2x32xf32, #tpu.memory_space<vmem>>, %arg10: memref<10x96xbf16, #tpu.memory_space<vmem>>) attributes {dimension_semantics = [#tpu.dimension_semantics<arbitrary>], iteration_bounds = array<i64: 1>, scalar_prefetch = 0 : i64, scratch_operands = 1 : i64, tpu.core_type = #tpu.core_type<tc>, window_params = [{pipeline_mode = #tpu.pipeline_mode<synchronous>, transform_indices = @transform_0, window_bounds = array<i64: 10, 192>}, {pipeline_mode = #tpu.pipeline_mode<synchronous>, transform_indices = @transform_1, window_bounds = array<i64: 10, 32>}, {pipeline_mode = #tpu.pipeline_mode<synchronous>, transform_indices = @transform_2, window_bounds = array<i64: 192, 32>}, {pipeline_mode = #tpu.pipeline_mode<synchronous>, transform_indices = @transform_3, window_bounds = array<i64: 32, 96>}, {pipeline_mode = #tpu.pipeline_mode<synchronous>, transform_indices = @transform_4, window_bounds = array<i64: 32, 32>}, {pipeline_mode = #tpu.pipeline_mode<synchronous>, transform_indices = @transform_5, window_bounds = array<i64: 32, 128>}, {pipeline_mode = #tpu.pipeline_mode<synchronous>, transform_indices = @transform_6, window_bounds = array<i64: 128, 32>}, {pipeline_mode = #tpu.pipeline_mode<synchronous>, transform_indices = @transform_7, window_bounds = array<i64: 10, 128>}, {pipeline_mode = #tpu.pipeline_mode<synchronous>, transform_indices = @transform_8, window_bounds = array<i64: 2, 32>}]} {
    %c0 = arith.constant 0 : index
    %c0_0 = arith.constant 0 : index
    %0 = vector.load %arg8[%c0, %c0_0] : memref<10x128xf32, #tpu.memory_space<vmem>>, vector<1x128xf32>
    %c1 = arith.constant 1 : index
    %c0_1 = arith.constant 0 : index
    %1 = vector.load %arg8[%c1, %c0_1] : memref<10x128xf32, #tpu.memory_space<vmem>>, vector<1x96xf32>
    %c2 = arith.constant 2 : index
    %c0_2 = arith.constant 0 : index
    %2 = vector.load %arg8[%c2, %c0_2] : memref<10x128xf32, #tpu.memory_space<vmem>>, vector<1x32xf32>
    %c3 = arith.constant 3 : index
    %c0_3 = arith.constant 0 : index
    %3 = vector.load %arg8[%c3, %c0_3] : memref<10x128xf32, #tpu.memory_space<vmem>>, vector<1x32xf32>
    %c4 = arith.constant 4 : index
    %c0_4 = arith.constant 0 : index
    %4 = vector.load %arg8[%c4, %c0_4] : memref<10x128xf32, #tpu.memory_space<vmem>>, vector<1x32xf32>
    %c5 = arith.constant 5 : index
    %c0_5 = arith.constant 0 : index
    %5 = vector.load %arg8[%c5, %c0_5] : memref<10x128xf32, #tpu.memory_space<vmem>>, vector<1x32xf32>
    %c6 = arith.constant 6 : index
    %c0_6 = arith.constant 0 : index
    %6 = vector.load %arg8[%c6, %c0_6] : memref<10x128xf32, #tpu.memory_space<vmem>>, vector<1x32xf32>
    %c7 = arith.constant 7 : index
    %c0_7 = arith.constant 0 : index
    %7 = vector.load %arg8[%c7, %c0_7] : memref<10x128xf32, #tpu.memory_space<vmem>>, vector<1x32xf32>
    %c8 = arith.constant 8 : index
    %c0_8 = arith.constant 0 : index
    %8 = vector.load %arg8[%c8, %c0_8] : memref<10x128xf32, #tpu.memory_space<vmem>>, vector<1x32xf32>
    %c9 = arith.constant 9 : index
    %c0_9 = arith.constant 0 : index
    %9 = vector.load %arg8[%c9, %c0_9] : memref<10x128xf32, #tpu.memory_space<vmem>>, vector<1x32xf32>
    %c0_10 = arith.constant 0 : index
    %c0_11 = arith.constant 0 : index
    %10 = vector.load %arg1[%c0_10, %c0_11] : memref<10x192xbf16, #tpu.memory_space<vmem>>, vector<10x192xbf16>
    %c0_12 = arith.constant 0 : index
    %c0_13 = arith.constant 0 : index
    %11 = vector.load %arg3[%c0_12, %c0_13] : memref<192x32xbf16, #tpu.memory_space<vmem>>, vector<192x32xbf16>
    %cst = arith.constant dense<0.000000e+00> : vector<10x32xf32>
    %12 = tpu.matmul %10, %11, %cst {dimension_numbers = #tpu.dot_dimension_numbers<[1], [0], [0], [1], [0, 0, 1, 1], [], []>} : vector<10x192xbf16>, vector<192x32xbf16>, vector<10x32xf32> -> vector<10x32xf32>
    %c0_14 = arith.constant 0 : index
    %c0_15 = arith.constant 0 : index
    %13 = vector.load %arg2[%c0_14, %c0_15] : memref<10x32xf32, #tpu.memory_space<vmem>>, vector<10x32xf32>
    %14 = arith.addf %12, %13 : vector<10x32xf32>
    %cst_16 = arith.constant dense<0.000000e+00> : vector<10xf32>
    %15 = vector.multi_reduction <add>, %14, %cst_16 [1] : vector<10x32xf32> to vector<10xf32>
    %16 = vector.shape_cast %15 : vector<10xf32> to vector<10x1xf32>
    %cst_17 = arith.constant 3.200000e+01 : f32
    %17 = vector.broadcast %cst_17 : f32 to vector<10x1xf32>
    %18 = arith.divf %16, %17 : vector<10x1xf32>
    %19 = vector.broadcast %18 : vector<10x1xf32> to vector<10x32xf32>
    %20 = arith.subf %14, %19 : vector<10x32xf32>
    %21 = arith.mulf %20, %20 : vector<10x32xf32>
    %cst_18 = arith.constant dense<0.000000e+00> : vector<10xf32>
    %22 = vector.multi_reduction <add>, %21, %cst_18 [1] : vector<10x32xf32> to vector<10xf32>
    %23 = vector.shape_cast %22 : vector<10xf32> to vector<10x1xf32>
    %cst_19 = arith.constant 3.200000e+01 : f32
    %24 = vector.broadcast %cst_19 : f32 to vector<10x1xf32>
    %25 = arith.divf %23, %24 : vector<10x1xf32>
    %cst_20 = arith.constant 9.99999997E-7 : f32
    %26 = vector.broadcast %cst_20 : f32 to vector<10x1xf32>
    %27 = arith.addf %25, %26 : vector<10x1xf32>
    %28 = math.rsqrt %27 : vector<10x1xf32>
    %29 = vector.broadcast %28 : vector<10x1xf32> to vector<10x32xf32>
    %30 = arith.mulf %20, %29 : vector<10x32xf32>
    %31 = vector.broadcast %2 : vector<1x32xf32> to vector<10x32xf32>
    %32 = arith.mulf %30, %31 : vector<10x32xf32>
    %33 = vector.broadcast %3 : vector<1x32xf32> to vector<10x32xf32>
    %34 = arith.addf %32, %33 : vector<10x32xf32>
    %35 = arith.truncf %34 : vector<10x32xf32> to vector<10x32xbf16>
    %c0_21 = arith.constant 0 : index
    %c0_22 = arith.constant 0 : index
    %36 = vector.load %arg4[%c0_21, %c0_22] : memref<32x96xbf16, #tpu.memory_space<vmem>>, vector<32x96xbf16>
    %cst_23 = arith.constant dense<0.000000e+00> : vector<10x96xf32>
    %37 = tpu.matmul %35, %36, %cst_23 {dimension_numbers = #tpu.dot_dimension_numbers<[1], [0], [0], [1], [0, 0, 1, 1], [], []>} : vector<10x32xbf16>, vector<32x96xbf16>, vector<10x96xf32> -> vector<10x96xf32>
    %38 = vector.broadcast %1 : vector<1x96xf32> to vector<10x96xf32>
    %39 = arith.addf %37, %38 : vector<10x96xf32>
    %40 = arith.truncf %39 : vector<10x96xf32> to vector<10x96xbf16>
    %c0_24 = arith.constant 0 : index
    %c0_25 = arith.constant 0 : index
    %41 = vector.load %arg10[%c0_24, %c0_25] : memref<10x96xbf16, #tpu.memory_space<vmem>>, vector<10x96xbf16>
    tpu.vector_store %arg10[%c0_24, %c0_25], %40 {strides = array<i32>} : memref<10x96xbf16, #tpu.memory_space<vmem>>, vector<10x96xbf16>,
    %c0_26 = arith.constant 0 : index
    %c0_27 = arith.constant 0 : index
    %42 = vector.load %arg10[%c0_26, %c0_27] : memref<10x96xbf16, #tpu.memory_space<vmem>>, vector<5x8xbf16>
    %c0_28 = arith.constant 0 : index
    %c32 = arith.constant 32 : index
    %43 = vector.load %arg10[%c0_28, %c32] : memref<10x96xbf16, #tpu.memory_space<vmem>>, vector<5x8xbf16>
    %c0_29 = arith.constant 0 : index
    %c64 = arith.constant 64 : index
    %44 = vector.load %arg10[%c0_29, %c64] : memref<10x96xbf16, #tpu.memory_space<vmem>>, vector<5x8xbf16>
    %cst_30 = arith.constant dense<0.000000e+00> : vector<5x5xf32>
    %45 = tpu.matmul %42, %43, %cst_30 {dimension_numbers = #tpu.dot_dimension_numbers<[1], [1], [0], [0], [0, 0, 1, 0], [], []>} : vector<5x8xbf16>, vector<5x8xbf16>, vector<5x5xf32> -> vector<5x5xf32>
    %cst_31 = arith.constant dense<0xFF800000> : vector<5xf32>
    %46 = vector.multi_reduction <maximumf>, %45, %cst_31 [1] : vector<5x5xf32> to vector<5xf32>
    %47 = vector.shape_cast %46 : vector<5xf32> to vector<5x1xf32>
    %48 = vector.broadcast %47 : vector<5x1xf32> to vector<5x5xf32>
    %49 = arith.subf %45, %48 : vector<5x5xf32>
    %50 = math.exp %49 : vector<5x5xf32>
    %cst_32 = arith.constant dense<0.000000e+00> : vector<5xf32>
    %51 = vector.multi_reduction <add>, %50, %cst_32 [1] : vector<5x5xf32> to vector<5xf32>
    %52 = vector.shape_cast %51 : vector<5xf32> to vector<5x1xf32>
    %53 = tpu.reciprocal %52 {approx = true} : vector<5x1xf32> -> vector<5x1xf32>
    %54 = vector.broadcast %53 : vector<5x1xf32> to vector<5x5xf32>
    %55 = arith.mulf %50, %54 : vector<5x5xf32>
    %56 = arith.truncf %55 : vector<5x5xf32> to vector<5x5xbf16>
    %cst_33 = arith.constant dense<0.000000e+00> : vector<5x8xf32>
    %57 = tpu.matmul %56, %44, %cst_33 {dimension_numbers = #tpu.dot_dimension_numbers<[1], [0], [0], [1], [0, 0, 1, 1], [], []>} : vector<5x5xbf16>, vector<5x8xbf16>, vector<5x8xf32> -> vector<5x8xf32>
    %58 = arith.truncf %57 : vector<5x8xf32> to vector<5x8xbf16>
    %c0_34 = arith.constant 0 : index
    %c0_35 = arith.constant 0 : index
    %59 = vector.load %arg5[%c0_34, %c0_35] : memref<32x32xbf16, #tpu.memory_space<vmem>>, vector<8x32xbf16>
    %cst_36 = arith.constant dense<0.000000e+00> : vector<5x32xf32>
    %60 = tpu.matmul %58, %59, %cst_36 {dimension_numbers = #tpu.dot_dimension_numbers<[1], [0], [0], [1], [0, 0, 1, 1], [], []>} : vector<5x8xbf16>, vector<8x32xbf16>, vector<5x32xf32> -> vector<5x32xf32>
    %c0_37 = arith.constant 0 : index
    %c8_38 = arith.constant 8 : index
    %61 = vector.load %arg10[%c0_37, %c8_38] : memref<10x96xbf16, #tpu.memory_space<vmem>>, vector<5x8xbf16>
    %c0_39 = arith.constant 0 : index
    %c40 = arith.constant 40 : index
    %62 = vector.load %arg10[%c0_39, %c40] : memref<10x96xbf16, #tpu.memory_space<vmem>>, vector<5x8xbf16>
    %c0_40 = arith.constant 0 : index
    %c72 = arith.constant 72 : index
    %63 = vector.load %arg10[%c0_40, %c72] : memref<10x96xbf16, #tpu.memory_space<vmem>>, vector<5x8xbf16>
    %cst_41 = arith.constant dense<0.000000e+00> : vector<5x5xf32>
    %64 = tpu.matmul %61, %62, %cst_41 {dimension_numbers = #tpu.dot_dimension_numbers<[1], [1], [0], [0], [0, 0, 1, 0], [], []>} : vector<5x8xbf16>, vector<5x8xbf16>, vector<5x5xf32> -> vector<5x5xf32>
    %cst_42 = arith.constant dense<0xFF800000> : vector<5xf32>
    %65 = vector.multi_reduction <maximumf>, %64, %cst_42 [1] : vector<5x5xf32> to vector<5xf32>
    %66 = vector.shape_cast %65 : vector<5xf32> to vector<5x1xf32>
    %67 = vector.broadcast %66 : vector<5x1xf32> to vector<5x5xf32>
    %68 = arith.subf %64, %67 : vector<5x5xf32>
    %69 = math.exp %68 : vector<5x5xf32>
    %cst_43 = arith.constant dense<0.000000e+00> : vector<5xf32>
    %70 = vector.multi_reduction <add>, %69, %cst_43 [1] : vector<5x5xf32> to vector<5xf32>
    %71 = vector.shape_cast %70 : vector<5xf32> to vector<5x1xf32>
    %72 = tpu.reciprocal %71 {approx = true} : vector<5x1xf32> -> vector<5x1xf32>
    %73 = vector.broadcast %72 : vector<5x1xf32> to vector<5x5xf32>
    %74 = arith.mulf %69, %73 : vector<5x5xf32>
    %75 = arith.truncf %74 : vector<5x5xf32> to vector<5x5xbf16>
    %cst_44 = arith.constant dense<0.000000e+00> : vector<5x8xf32>
    %76 = tpu.matmul %75, %63, %cst_44 {dimension_numbers = #tpu.dot_dimension_numbers<[1], [0], [0], [1], [0, 0, 1, 1], [], []>} : vector<5x5xbf16>, vector<5x8xbf16>, vector<5x8xf32> -> vector<5x8xf32>
    %77 = arith.truncf %76 : vector<5x8xf32> to vector<5x8xbf16>
    %c8_45 = arith.constant 8 : index
    %c0_46 = arith.constant 0 : index
    %78 = vector.load %arg5[%c8_45, %c0_46] : memref<32x32xbf16, #tpu.memory_space<vmem>>, vector<8x32xbf16>
    %cst_47 = arith.constant dense<0.000000e+00> : vector<5x32xf32>
    %79 = tpu.matmul %77, %78, %cst_47 {dimension_numbers = #tpu.dot_dimension_numbers<[1], [0], [0], [1], [0, 0, 1, 1], [], []>} : vector<5x8xbf16>, vector<8x32xbf16>, vector<5x32xf32> -> vector<5x32xf32>
    %80 = arith.addf %60, %79 : vector<5x32xf32>
    %c0_48 = arith.constant 0 : index
    %c16 = arith.constant 16 : index
    %81 = vector.load %arg10[%c0_48, %c16] : memref<10x96xbf16, #tpu.memory_space<vmem>>, vector<5x8xbf16>
    %c0_49 = arith.constant 0 : index
    %c48 = arith.constant 48 : index
    %82 = vector.load %arg10[%c0_49, %c48] : memref<10x96xbf16, #tpu.memory_space<vmem>>, vector<5x8xbf16>
    %c0_50 = arith.constant 0 : index
    %c80 = arith.constant 80 : index
    %83 = vector.load %arg10[%c0_50, %c80] : memref<10x96xbf16, #tpu.memory_space<vmem>>, vector<5x8xbf16>
    %cst_51 = arith.constant dense<0.000000e+00> : vector<5x5xf32>
    %84 = tpu.matmul %81, %82, %cst_51 {dimension_numbers = #tpu.dot_dimension_numbers<[1], [1], [0], [0], [0, 0, 1, 0], [], []>} : vector<5x8xbf16>, vector<5x8xbf16>, vector<5x5xf32> -> vector<5x5xf32>
    %cst_52 = arith.constant dense<0xFF800000> : vector<5xf32>
    %85 = vector.multi_reduction <maximumf>, %84, %cst_52 [1] : vector<5x5xf32> to vector<5xf32>
    %86 = vector.shape_cast %85 : vector<5xf32> to vector<5x1xf32>
    %87 = vector.broadcast %86 : vector<5x1xf32> to vector<5x5xf32>
    %88 = arith.subf %84, %87 : vector<5x5xf32>
    %89 = math.exp %88 : vector<5x5xf32>
    %cst_53 = arith.constant dense<0.000000e+00> : vector<5xf32>
    %90 = vector.multi_reduction <add>, %89, %cst_53 [1] : vector<5x5xf32> to vector<5xf32>
    %91 = vector.shape_cast %90 : vector<5xf32> to vector<5x1xf32>
    %92 = tpu.reciprocal %91 {approx = true} : vector<5x1xf32> -> vector<5x1xf32>
    %93 = vector.broadcast %92 : vector<5x1xf32> to vector<5x5xf32>
    %94 = arith.mulf %89, %93 : vector<5x5xf32>
    %95 = arith.truncf %94 : vector<5x5xf32> to vector<5x5xbf16>
    %cst_54 = arith.constant dense<0.000000e+00> : vector<5x8xf32>
    %96 = tpu.matmul %95, %83, %cst_54 {dimension_numbers = #tpu.dot_dimension_numbers<[1], [0], [0], [1], [0, 0, 1, 1], [], []>} : vector<5x5xbf16>, vector<5x8xbf16>, vector<5x8xf32> -> vector<5x8xf32>
    %97 = arith.truncf %96 : vector<5x8xf32> to vector<5x8xbf16>
    %c16_55 = arith.constant 16 : index
    %c0_56 = arith.constant 0 : index
    %98 = vector.load %arg5[%c16_55, %c0_56] : memref<32x32xbf16, #tpu.memory_space<vmem>>, vector<8x32xbf16>
    %cst_57 = arith.constant dense<0.000000e+00> : vector<5x32xf32>
    %99 = tpu.matmul %97, %98, %cst_57 {dimension_numbers = #tpu.dot_dimension_numbers<[1], [0], [0], [1], [0, 0, 1, 1], [], []>} : vector<5x8xbf16>, vector<8x32xbf16>, vector<5x32xf32> -> vector<5x32xf32>
    %100 = arith.addf %80, %99 : vector<5x32xf32>
    %c0_58 = arith.constant 0 : index
    %c24 = arith.constant 24 : index
    %101 = vector.load %arg10[%c0_58, %c24] : memref<10x96xbf16, #tpu.memory_space<vmem>>, vector<5x8xbf16>
    %c0_59 = arith.constant 0 : index
    %c56 = arith.constant 56 : index
    %102 = vector.load %arg10[%c0_59, %c56] : memref<10x96xbf16, #tpu.memory_space<vmem>>, vector<5x8xbf16>
    %c0_60 = arith.constant 0 : index
    %c88 = arith.constant 88 : index
    %103 = vector.load %arg10[%c0_60, %c88] : memref<10x96xbf16, #tpu.memory_space<vmem>>, vector<5x8xbf16>
    %cst_61 = arith.constant dense<0.000000e+00> : vector<5x5xf32>
    %104 = tpu.matmul %101, %102, %cst_61 {dimension_numbers = #tpu.dot_dimension_numbers<[1], [1], [0], [0], [0, 0, 1, 0], [], []>} : vector<5x8xbf16>, vector<5x8xbf16>, vector<5x5xf32> -> vector<5x5xf32>
    %cst_62 = arith.constant dense<0xFF800000> : vector<5xf32>
    %105 = vector.multi_reduction <maximumf>, %104, %cst_62 [1] : vector<5x5xf32> to vector<5xf32>
    %106 = vector.shape_cast %105 : vector<5xf32> to vector<5x1xf32>
    %107 = vector.broadcast %106 : vector<5x1xf32> to vector<5x5xf32>
    %108 = arith.subf %104, %107 : vector<5x5xf32>
    %109 = math.exp %108 : vector<5x5xf32>
    %cst_63 = arith.constant dense<0.000000e+00> : vector<5xf32>
    %110 = vector.multi_reduction <add>, %109, %cst_63 [1] : vector<5x5xf32> to vector<5xf32>
    %111 = vector.shape_cast %110 : vector<5xf32> to vector<5x1xf32>
    %112 = tpu.reciprocal %111 {approx = true} : vector<5x1xf32> -> vector<5x1xf32>
    %113 = vector.broadcast %112 : vector<5x1xf32> to vector<5x5xf32>
    %114 = arith.mulf %109, %113 : vector<5x5xf32>
    %115 = arith.truncf %114 : vector<5x5xf32> to vector<5x5xbf16>
    %cst_64 = arith.constant dense<0.000000e+00> : vector<5x8xf32>
    %116 = tpu.matmul %115, %103, %cst_64 {dimension_numbers = #tpu.dot_dimension_numbers<[1], [0], [0], [1], [0, 0, 1, 1], [], []>} : vector<5x5xbf16>, vector<5x8xbf16>, vector<5x8xf32> -> vector<5x8xf32>
    %117 = arith.truncf %116 : vector<5x8xf32> to vector<5x8xbf16>
    %c24_65 = arith.constant 24 : index
    %c0_66 = arith.constant 0 : index
    %118 = vector.load %arg5[%c24_65, %c0_66] : memref<32x32xbf16, #tpu.memory_space<vmem>>, vector<8x32xbf16>
    %cst_67 = arith.constant dense<0.000000e+00> : vector<5x32xf32>
    %119 = tpu.matmul %117, %118, %cst_67 {dimension_numbers = #tpu.dot_dimension_numbers<[1], [0], [0], [1], [0, 0, 1, 1], [], []>} : vector<5x8xbf16>, vector<8x32xbf16>, vector<5x32xf32> -> vector<5x32xf32>
    %120 = arith.addf %100, %119 : vector<5x32xf32>
    %c5_68 = arith.constant 5 : index
    %c0_69 = arith.constant 0 : index
    %121 = vector.load %arg10[%c5_68, %c0_69] : memref<10x96xbf16, #tpu.memory_space<vmem>>, vector<5x8xbf16>
    %c5_70 = arith.constant 5 : index
    %c32_71 = arith.constant 32 : index
    %122 = vector.load %arg10[%c5_70, %c32_71] : memref<10x96xbf16, #tpu.memory_space<vmem>>, vector<5x8xbf16>
    %c5_72 = arith.constant 5 : index
    %c64_73 = arith.constant 64 : index
    %123 = vector.load %arg10[%c5_72, %c64_73] : memref<10x96xbf16, #tpu.memory_space<vmem>>, vector<5x8xbf16>
    %cst_74 = arith.constant dense<0.000000e+00> : vector<5x5xf32>
    %124 = tpu.matmul %121, %122, %cst_74 {dimension_numbers = #tpu.dot_dimension_numbers<[1], [1], [0], [0], [0, 0, 1, 0], [], []>} : vector<5x8xbf16>, vector<5x8xbf16>, vector<5x5xf32> -> vector<5x5xf32>
    %cst_75 = arith.constant dense<0xFF800000> : vector<5xf32>
    %125 = vector.multi_reduction <maximumf>, %124, %cst_75 [1] : vector<5x5xf32> to vector<5xf32>
    %126 = vector.shape_cast %125 : vector<5xf32> to vector<5x1xf32>
    %127 = vector.broadcast %126 : vector<5x1xf32> to vector<5x5xf32>
    %128 = arith.subf %124, %127 : vector<5x5xf32>
    %129 = math.exp %128 : vector<5x5xf32>
    %cst_76 = arith.constant dense<0.000000e+00> : vector<5xf32>
    %130 = vector.multi_reduction <add>, %129, %cst_76 [1] : vector<5x5xf32> to vector<5xf32>
    %131 = vector.shape_cast %130 : vector<5xf32> to vector<5x1xf32>
    %132 = tpu.reciprocal %131 {approx = true} : vector<5x1xf32> -> vector<5x1xf32>
    %133 = vector.broadcast %132 : vector<5x1xf32> to vector<5x5xf32>
    %134 = arith.mulf %129, %133 : vector<5x5xf32>
    %135 = arith.truncf %134 : vector<5x5xf32> to vector<5x5xbf16>
    %cst_77 = arith.constant dense<0.000000e+00> : vector<5x8xf32>
    %136 = tpu.matmul %135, %123, %cst_77 {dimension_numbers = #tpu.dot_dimension_numbers<[1], [0], [0], [1], [0, 0, 1, 1], [], []>} : vector<5x5xbf16>, vector<5x8xbf16>, vector<5x8xf32> -> vector<5x8xf32>
    %137 = arith.truncf %136 : vector<5x8xf32> to vector<5x8xbf16>
    %c0_78 = arith.constant 0 : index
    %c0_79 = arith.constant 0 : index
    %138 = vector.load %arg5[%c0_78, %c0_79] : memref<32x32xbf16, #tpu.memory_space<vmem>>, vector<8x32xbf16>
    %cst_80 = arith.constant dense<0.000000e+00> : vector<5x32xf32>
    %139 = tpu.matmul %137, %138, %cst_80 {dimension_numbers = #tpu.dot_dimension_numbers<[1], [0], [0], [1], [0, 0, 1, 1], [], []>} : vector<5x8xbf16>, vector<8x32xbf16>, vector<5x32xf32> -> vector<5x32xf32>
    %c5_81 = arith.constant 5 : index
    %c8_82 = arith.constant 8 : index
    %140 = vector.load %arg10[%c5_81, %c8_82] : memref<10x96xbf16, #tpu.memory_space<vmem>>, vector<5x8xbf16>
    %c5_83 = arith.constant 5 : index
    %c40_84 = arith.constant 40 : index
    %141 = vector.load %arg10[%c5_83, %c40_84] : memref<10x96xbf16, #tpu.memory_space<vmem>>, vector<5x8xbf16>
    %c5_85 = arith.constant 5 : index
    %c72_86 = arith.constant 72 : index
    %142 = vector.load %arg10[%c5_85, %c72_86] : memref<10x96xbf16, #tpu.memory_space<vmem>>, vector<5x8xbf16>
    %cst_87 = arith.constant dense<0.000000e+00> : vector<5x5xf32>
    %143 = tpu.matmul %140, %141, %cst_87 {dimension_numbers = #tpu.dot_dimension_numbers<[1], [1], [0], [0], [0, 0, 1, 0], [], []>} : vector<5x8xbf16>, vector<5x8xbf16>, vector<5x5xf32> -> vector<5x5xf32>
    %cst_88 = arith.constant dense<0xFF800000> : vector<5xf32>
    %144 = vector.multi_reduction <maximumf>, %143, %cst_88 [1] : vector<5x5xf32> to vector<5xf32>
    %145 = vector.shape_cast %144 : vector<5xf32> to vector<5x1xf32>
    %146 = vector.broadcast %145 : vector<5x1xf32> to vector<5x5xf32>
    %147 = arith.subf %143, %146 : vector<5x5xf32>
    %148 = math.exp %147 : vector<5x5xf32>
    %cst_89 = arith.constant dense<0.000000e+00> : vector<5xf32>
    %149 = vector.multi_reduction <add>, %148, %cst_89 [1] : vector<5x5xf32> to vector<5xf32>
    %150 = vector.shape_cast %149 : vector<5xf32> to vector<5x1xf32>
    %151 = tpu.reciprocal %150 {approx = true} : vector<5x1xf32> -> vector<5x1xf32>
    %152 = vector.broadcast %151 : vector<5x1xf32> to vector<5x5xf32>
    %153 = arith.mulf %148, %152 : vector<5x5xf32>
    %154 = arith.truncf %153 : vector<5x5xf32> to vector<5x5xbf16>
    %cst_90 = arith.constant dense<0.000000e+00> : vector<5x8xf32>
    %155 = tpu.matmul %154, %142, %cst_90 {dimension_numbers = #tpu.dot_dimension_numbers<[1], [0], [0], [1], [0, 0, 1, 1], [], []>} : vector<5x5xbf16>, vector<5x8xbf16>, vector<5x8xf32> -> vector<5x8xf32>
    %156 = arith.truncf %155 : vector<5x8xf32> to vector<5x8xbf16>
    %c8_91 = arith.constant 8 : index
    %c0_92 = arith.constant 0 : index
    %157 = vector.load %arg5[%c8_91, %c0_92] : memref<32x32xbf16, #tpu.memory_space<vmem>>, vector<8x32xbf16>
    %cst_93 = arith.constant dense<0.000000e+00> : vector<5x32xf32>
    %158 = tpu.matmul %156, %157, %cst_93 {dimension_numbers = #tpu.dot_dimension_numbers<[1], [0], [0], [1], [0, 0, 1, 1], [], []>} : vector<5x8xbf16>, vector<8x32xbf16>, vector<5x32xf32> -> vector<5x32xf32>
    %159 = arith.addf %139, %158 : vector<5x32xf32>
    %c5_94 = arith.constant 5 : index
    %c16_95 = arith.constant 16 : index
    %160 = vector.load %arg10[%c5_94, %c16_95] : memref<10x96xbf16, #tpu.memory_space<vmem>>, vector<5x8xbf16>
    %c5_96 = arith.constant 5 : index
    %c48_97 = arith.constant 48 : index
    %161 = vector.load %arg10[%c5_96, %c48_97] : memref<10x96xbf16, #tpu.memory_space<vmem>>, vector<5x8xbf16>
    %c5_98 = arith.constant 5 : index
    %c80_99 = arith.constant 80 : index
    %162 = vector.load %arg10[%c5_98, %c80_99] : memref<10x96xbf16, #tpu.memory_space<vmem>>, vector<5x8xbf16>
    %cst_100 = arith.constant dense<0.000000e+00> : vector<5x5xf32>
    %163 = tpu.matmul %160, %161, %cst_100 {dimension_numbers = #tpu.dot_dimension_numbers<[1], [1], [0], [0], [0, 0, 1, 0], [], []>} : vector<5x8xbf16>, vector<5x8xbf16>, vector<5x5xf32> -> vector<5x5xf32>
    %cst_101 = arith.constant dense<0xFF800000> : vector<5xf32>
    %164 = vector.multi_reduction <maximumf>, %163, %cst_101 [1] : vector<5x5xf32> to vector<5xf32>
    %165 = vector.shape_cast %164 : vector<5xf32> to vector<5x1xf32>
    %166 = vector.broadcast %165 : vector<5x1xf32> to vector<5x5xf32>
    %167 = arith.subf %163, %166 : vector<5x5xf32>
    %168 = math.exp %167 : vector<5x5xf32>
    %cst_102 = arith.constant dense<0.000000e+00> : vector<5xf32>
    %169 = vector.multi_reduction <add>, %168, %cst_102 [1] : vector<5x5xf32> to vector<5xf32>
    %170 = vector.shape_cast %169 : vector<5xf32> to vector<5x1xf32>
    %171 = tpu.reciprocal %170 {approx = true} : vector<5x1xf32> -> vector<5x1xf32>
    %172 = vector.broadcast %171 : vector<5x1xf32> to vector<5x5xf32>
    %173 = arith.mulf %168, %172 : vector<5x5xf32>
    %174 = arith.truncf %173 : vector<5x5xf32> to vector<5x5xbf16>
    %cst_103 = arith.constant dense<0.000000e+00> : vector<5x8xf32>
    %175 = tpu.matmul %174, %162, %cst_103 {dimension_numbers = #tpu.dot_dimension_numbers<[1], [0], [0], [1], [0, 0, 1, 1], [], []>} : vector<5x5xbf16>, vector<5x8xbf16>, vector<5x8xf32> -> vector<5x8xf32>
    %176 = arith.truncf %175 : vector<5x8xf32> to vector<5x8xbf16>
    %c16_104 = arith.constant 16 : index
    %c0_105 = arith.constant 0 : index
    %177 = vector.load %arg5[%c16_104, %c0_105] : memref<32x32xbf16, #tpu.memory_space<vmem>>, vector<8x32xbf16>
    %cst_106 = arith.constant dense<0.000000e+00> : vector<5x32xf32>
    %178 = tpu.matmul %176, %177, %cst_106 {dimension_numbers = #tpu.dot_dimension_numbers<[1], [0], [0], [1], [0, 0, 1, 1], [], []>} : vector<5x8xbf16>, vector<8x32xbf16>, vector<5x32xf32> -> vector<5x32xf32>
    %179 = arith.addf %159, %178 : vector<5x32xf32>
    %c5_107 = arith.constant 5 : index
    %c24_108 = arith.constant 24 : index
    %180 = vector.load %arg10[%c5_107, %c24_108] : memref<10x96xbf16, #tpu.memory_space<vmem>>, vector<5x8xbf16>
    %c5_109 = arith.constant 5 : index
    %c56_110 = arith.constant 56 : index
    %181 = vector.load %arg10[%c5_109, %c56_110] : memref<10x96xbf16, #tpu.memory_space<vmem>>, vector<5x8xbf16>
    %c5_111 = arith.constant 5 : index
    %c88_112 = arith.constant 88 : index
    %182 = vector.load %arg10[%c5_111, %c88_112] : memref<10x96xbf16, #tpu.memory_space<vmem>>, vector<5x8xbf16>
    %cst_113 = arith.constant dense<0.000000e+00> : vector<5x5xf32>
    %183 = tpu.matmul %180, %181, %cst_113 {dimension_numbers = #tpu.dot_dimension_numbers<[1], [1], [0], [0], [0, 0, 1, 0], [], []>} : vector<5x8xbf16>, vector<5x8xbf16>, vector<5x5xf32> -> vector<5x5xf32>
    %cst_114 = arith.constant dense<0xFF800000> : vector<5xf32>
    %184 = vector.multi_reduction <maximumf>, %183, %cst_114 [1] : vector<5x5xf32> to vector<5xf32>
    %185 = vector.shape_cast %184 : vector<5xf32> to vector<5x1xf32>
    %186 = vector.broadcast %185 : vector<5x1xf32> to vector<5x5xf32>
    %187 = arith.subf %183, %186 : vector<5x5xf32>
    %188 = math.exp %187 : vector<5x5xf32>
    %cst_115 = arith.constant dense<0.000000e+00> : vector<5xf32>
    %189 = vector.multi_reduction <add>, %188, %cst_115 [1] : vector<5x5xf32> to vector<5xf32>
    %190 = vector.shape_cast %189 : vector<5xf32> to vector<5x1xf32>
    %191 = tpu.reciprocal %190 {approx = true} : vector<5x1xf32> -> vector<5x1xf32>
    %192 = vector.broadcast %191 : vector<5x1xf32> to vector<5x5xf32>
    %193 = arith.mulf %188, %192 : vector<5x5xf32>
    %194 = arith.truncf %193 : vector<5x5xf32> to vector<5x5xbf16>
    %cst_116 = arith.constant dense<0.000000e+00> : vector<5x8xf32>
    %195 = tpu.matmul %194, %182, %cst_116 {dimension_numbers = #tpu.dot_dimension_numbers<[1], [0], [0], [1], [0, 0, 1, 1], [], []>} : vector<5x5xbf16>, vector<5x8xbf16>, vector<5x8xf32> -> vector<5x8xf32>
    %196 = arith.truncf %195 : vector<5x8xf32> to vector<5x8xbf16>
    %c24_117 = arith.constant 24 : index
    %c0_118 = arith.constant 0 : index
    %197 = vector.load %arg5[%c24_117, %c0_118] : memref<32x32xbf16, #tpu.memory_space<vmem>>, vector<8x32xbf16>
    %cst_119 = arith.constant dense<0.000000e+00> : vector<5x32xf32>
    %198 = tpu.matmul %196, %197, %cst_119 {dimension_numbers = #tpu.dot_dimension_numbers<[1], [0], [0], [1], [0, 0, 1, 1], [], []>} : vector<5x8xbf16>, vector<8x32xbf16>, vector<5x32xf32> -> vector<5x32xf32>
    %199 = arith.addf %179, %198 : vector<5x32xf32>
    %200 = tpu.concatenate %120, %199 in 0 : vector<5x32xf32>, vector<5x32xf32> -> vector<10x32xf32>
    %201 = arith.addf %14, %200 : vector<10x32xf32>
    %202 = vector.broadcast %4 : vector<1x32xf32> to vector<10x32xf32>
    %203 = arith.addf %201, %202 : vector<10x32xf32>
    %cst_120 = arith.constant dense<0.000000e+00> : vector<10xf32>
    %204 = vector.multi_reduction <add>, %203, %cst_120 [1] : vector<10x32xf32> to vector<10xf32>
    %205 = vector.shape_cast %204 : vector<10xf32> to vector<10x1xf32>
    %cst_121 = arith.constant 3.200000e+01 : f32
    %206 = vector.broadcast %cst_121 : f32 to vector<10x1xf32>
    %207 = arith.divf %205, %206 : vector<10x1xf32>
    %208 = vector.broadcast %207 : vector<10x1xf32> to vector<10x32xf32>
    %209 = arith.subf %203, %208 : vector<10x32xf32>
    %210 = arith.mulf %209, %209 : vector<10x32xf32>
    %cst_122 = arith.constant dense<0.000000e+00> : vector<10xf32>
    %211 = vector.multi_reduction <add>, %210, %cst_122 [1] : vector<10x32xf32> to vector<10xf32>
    %212 = vector.shape_cast %211 : vector<10xf32> to vector<10x1xf32>
    %cst_123 = arith.constant 3.200000e+01 : f32
    %213 = vector.broadcast %cst_123 : f32 to vector<10x1xf32>
    %214 = arith.divf %212, %213 : vector<10x1xf32>
    %cst_124 = arith.constant 9.99999997E-7 : f32
    %215 = vector.broadcast %cst_124 : f32 to vector<10x1xf32>
    %216 = arith.addf %214, %215 : vector<10x1xf32>
    %217 = math.rsqrt %216 : vector<10x1xf32>
    %218 = vector.broadcast %217 : vector<10x1xf32> to vector<10x32xf32>
    %219 = arith.mulf %209, %218 : vector<10x32xf32>
    %220 = vector.broadcast %5 : vector<1x32xf32> to vector<10x32xf32>
    %221 = arith.mulf %219, %220 : vector<10x32xf32>
    %222 = vector.broadcast %6 : vector<1x32xf32> to vector<10x32xf32>
    %223 = arith.addf %221, %222 : vector<10x32xf32>
    %224 = arith.truncf %223 : vector<10x32xf32> to vector<10x32xbf16>
    %c0_125 = arith.constant 0 : index
    %c0_126 = arith.constant 0 : index
    %225 = vector.load %arg6[%c0_125, %c0_126] : memref<32x128xbf16, #tpu.memory_space<vmem>>, vector<32x128xbf16>
    %cst_127 = arith.constant dense<0.000000e+00> : vector<10x128xf32>
    %226 = tpu.matmul %224, %225, %cst_127 {dimension_numbers = #tpu.dot_dimension_numbers<[1], [0], [0], [1], [0, 0, 1, 1], [], []>} : vector<10x32xbf16>, vector<32x128xbf16>, vector<10x128xf32> -> vector<10x128xf32>
    %227 = vector.broadcast %0 : vector<1x128xf32> to vector<10x128xf32>
    %228 = arith.addf %226, %227 : vector<10x128xf32>
    %cst_128 = arith.constant 5.000000e-01 : f32
    %229 = vector.broadcast %cst_128 : f32 to vector<10x128xf32>
    %230 = arith.mulf %229, %228 : vector<10x128xf32>
    %cst_129 = arith.constant 4.471500e-02 : f32
    %231 = vector.broadcast %cst_129 : f32 to vector<10x128xf32>
    %232 = arith.mulf %231, %228 : vector<10x128xf32>
    %233 = arith.mulf %232, %228 : vector<10x128xf32>
    %234 = arith.mulf %233, %228 : vector<10x128xf32>
    %235 = arith.addf %228, %234 : vector<10x128xf32>
    %cst_130 = arith.constant 0.797884583 : f32
    %236 = vector.broadcast %cst_130 : f32 to vector<10x128xf32>
    %237 = arith.mulf %236, %235 : vector<10x128xf32>
    %238 = math.tanh %237 : vector<10x128xf32>
    %cst_131 = arith.constant 1.000000e+00 : f32
    %239 = vector.broadcast %cst_131 : f32 to vector<10x128xf32>
    %240 = arith.addf %239, %238 : vector<10x128xf32>
    %241 = arith.mulf %230, %240 : vector<10x128xf32>
    %242 = arith.truncf %241 : vector<10x128xf32> to vector<10x128xbf16>
    %c0_132 = arith.constant 0 : index
    %c0_133 = arith.constant 0 : index
    %243 = vector.load %arg7[%c0_132, %c0_133] : memref<128x32xbf16, #tpu.memory_space<vmem>>, vector<128x32xbf16>
    %cst_134 = arith.constant dense<0.000000e+00> : vector<10x32xf32>
    %244 = tpu.matmul %242, %243, %cst_134 {dimension_numbers = #tpu.dot_dimension_numbers<[1], [0], [0], [1], [0, 0, 1, 1], [], []>} : vector<10x128xbf16>, vector<128x32xbf16>, vector<10x32xf32> -> vector<10x32xf32>
    %245 = vector.broadcast %7 : vector<1x32xf32> to vector<10x32xf32>
    %246 = arith.addf %244, %245 : vector<10x32xf32>
    %247 = arith.addf %203, %246 : vector<10x32xf32>
    %248 = vector.extract_strided_slice %247 {offsets = [0, 0], sizes = [1, 32], strides = [1, 1]} : vector<10x32xf32> to vector<1x32xf32>
    %249 = vector.extract_strided_slice %247 {offsets = [5, 0], sizes = [1, 32], strides = [1, 1]} : vector<10x32xf32> to vector<1x32xf32>
    %250 = tpu.concatenate %248, %249 in 0 : vector<1x32xf32>, vector<1x32xf32> -> vector<2x32xf32>
    %cst_135 = arith.constant dense<0.000000e+00> : vector<2xf32>
    %251 = vector.multi_reduction <add>, %250, %cst_135 [1] : vector<2x32xf32> to vector<2xf32>
    %252 = vector.shape_cast %251 : vector<2xf32> to vector<2x1xf32>
    %cst_136 = arith.constant 3.200000e+01 : f32
    %253 = vector.broadcast %cst_136 : f32 to vector<2x1xf32>
    %254 = arith.divf %252, %253 : vector<2x1xf32>
    %255 = vector.broadcast %254 : vector<2x1xf32> to vector<2x32xf32>
    %256 = arith.subf %250, %255 : vector<2x32xf32>
    %257 = arith.mulf %256, %256 : vector<2x32xf32>
    %cst_137 = arith.constant dense<0.000000e+00> : vector<2xf32>
    %258 = vector.multi_reduction <add>, %257, %cst_137 [1] : vector<2x32xf32> to vector<2xf32>
    %259 = vector.shape_cast %258 : vector<2xf32> to vector<2x1xf32>
    %cst_138 = arith.constant 3.200000e+01 : f32
    %260 = vector.broadcast %cst_138 : f32 to vector<2x1xf32>
    %261 = arith.divf %259, %260 : vector<2x1xf32>
    %cst_139 = arith.constant 9.99999997E-7 : f32
    %262 = vector.broadcast %cst_139 : f32 to vector<2x1xf32>
    %263 = arith.addf %261, %262 : vector<2x1xf32>
    %264 = math.rsqrt %263 : vector<2x1xf32>
    %265 = vector.broadcast %264 : vector<2x1xf32> to vector<2x32xf32>
    %266 = arith.mulf %256, %265 : vector<2x32xf32>
    %267 = vector.broadcast %8 : vector<1x32xf32> to vector<2x32xf32>
    %268 = arith.mulf %266, %267 : vector<2x32xf32>
    %269 = vector.broadcast %9 : vector<1x32xf32> to vector<2x32xf32>
    %270 = arith.addf %268, %269 : vector<2x32xf32>
    %c0_140 = arith.constant 0 : index
    %c0_141 = arith.constant 0 : index
    %271 = vector.load %arg9[%c0_140, %c0_141] : memref<2x32xf32, #tpu.memory_space<vmem>>, vector<2x32xf32>
    tpu.vector_store %arg9[%c0_140, %c0_141], %270 {strides = array<i32>} : memref<2x32xf32, #tpu.memory_space<vmem>>, vector<2x32xf32>,
    return
  }
  func.func @transform_0(%arg0: i32) -> (i32, i32) {
    %c0_i32 = arith.constant 0 : i32
    %c0_i32_0 = arith.constant 0 : i32
    %c0_i32_1 = arith.constant 0 : i32
    return %c0_i32, %c0_i32_0 : i32, i32
  }
  func.func @transform_1(%arg0: i32) -> (i32, i32) {
    %c0_i32 = arith.constant 0 : i32
    %c0_i32_0 = arith.constant 0 : i32
    %c0_i32_1 = arith.constant 0 : i32
    return %c0_i32, %c0_i32_0 : i32, i32
  }
  func.func @transform_2(%arg0: i32) -> (i32, i32) {
    %c0_i32 = arith.constant 0 : i32
    %c0_i32_0 = arith.constant 0 : i32
    %c0_i32_1 = arith.constant 0 : i32
    return %c0_i32, %c0_i32_0 : i32, i32
  }
  func.func @transform_3(%arg0: i32) -> (i32, i32) {
    %c0_i32 = arith.constant 0 : i32
    %c0_i32_0 = arith.constant 0 : i32
    %c0_i32_1 = arith.constant 0 : i32
    return %c0_i32, %c0_i32_0 : i32, i32
  }
  func.func @transform_4(%arg0: i32) -> (i32, i32) {
    %c0_i32 = arith.constant 0 : i32
    %c0_i32_0 = arith.constant 0 : i32
    %c0_i32_1 = arith.constant 0 : i32
    return %c0_i32, %c0_i32_0 : i32, i32
  }
  func.func @transform_5(%arg0: i32) -> (i32, i32) {
    %c0_i32 = arith.constant 0 : i32
    %c0_i32_0 = arith.constant 0 : i32
    %c0_i32_1 = arith.constant 0 : i32
    return %c0_i32, %c0_i32_0 : i32, i32
  }
  func.func @transform_6(%arg0: i32) -> (i32, i32) {
    %c0_i32 = arith.constant 0 : i32
    %c0_i32_0 = arith.constant 0 : i32
    %c0_i32_1 = arith.constant 0 : i32
    return %c0_i32, %c0_i32_0 : i32, i32
  }
  func.func @transform_7(%arg0: i32) -> (i32, i32) {
    %c0_i32 = arith.constant 0 : i32
    %c0_i32_0 = arith.constant 0 : i32
    %c0_i32_1 = arith.constant 0 : i32
    return %c0_i32, %c0_i32_0 : i32, i32
  }
  func.func @transform_8(%arg0: i32) -> (i32, i32) {
    %c0_i32 = arith.constant 0 : i32
    %c0_i32_0 = arith.constant 0 : i32
    %c0_i32_1 = arith.constant 0 : i32
    return %c0_i32, %c0_i32_0 : i32, i32
  }
}

</mosaic_0001>

<bundles_post_ra>
// kernel: tile.9
= control target key start
LH: loop header
LB: loop body
LE: loop exit
PB: predicated region body
PF: predicated region fallthrough
CT: control target
= control target key end

     0   :  { %vm3_vm0 = vcmask 261120   ;;  %s34_s0 = inlined_call_operand.vmem [shape: f32[2,5,32], index: 0, kind: input, shape index: {}]   ;;  %s35_s1 = inlined_call_operand.vmem [shape: f32[10,32], index: 1, kind: output, shape index: {}]  }
   0x1   :  { %v2_v0 = vld [vmem:[%s34_s0] sm:$0x1f]   ;;  %v10_v1 = vld [vmem:[%s34_s0 + $0x8] sm:$0x1f]  }
   0x2   :  { %4 = vst.msk [vmem:[%s35_s1] sm:$0x1f] %vm3_vm0, %v2_v0  }
   0x3   :  { %11 = vst.msk [vmem:[%s35_s1 + $0x5] sm:$0x1f] %vm3_vm0, %v10_v1  }

// kernel: mul.9
= control target key start
LH: loop header
LB: loop body
LE: loop exit
PB: predicated region body
PF: predicated region fallthrough
CT: control target
= control target key end

     0   :  { %s34_s0 = inlined_call_operand.vmem [shape: f32[96], index: 0, kind: input, shape index: {}]   ;;  %s35_s1 = inlined_call_operand.vmem [shape: f32[96], index: 1, kind: input, shape index: {}]   ;;  %s36_s2 = inlined_call_operand.vmem [shape: f32[96], index: 2, kind: output, shape index: {}]  }
   0x1   :  { %v3_v0 = vld [vmem:[%s34_s0] sm:$0x1] }
   0x2   :  { %v4_v1 = vld [vmem:[%s35_s1] sm:$0x1] }
   0x3   :  { %v7_v2 = vmul.f32 %v4_v1, %v3_v0 }
   0x5   :  { %9 = vst [vmem:[%s36_s2] sm:$0x1] %v7_v2 }

// kernel: xyz_model_forward.1
= control target key start
LH: loop header
LB: loop body
LE: loop exit
PB: predicated region body
PF: predicated region fallthrough
CT: control target
= control target key end

     0   :  { %s1782_s0 = inlined_call_operand.vmem [shape: bf16[10,192], index: 0, kind: input, shape index: {}]   ;;  %s1783_s1 = inlined_call_operand.vmem [shape: f32[10,32], index: 1, kind: input, shape index: {}]   ;;  %s1784_s2 = inlined_call_operand.vmem [shape: bf16[192,32], index: 2, kind: input, shape index: {}]   ;;  %s1785_s3 = inlined_call_operand.vmem [shape: bf16[32,96], index: 3, kind: input, shape index: {}]   ;;  %s1786_s4 = inlined_call_operand.vmem [shape: bf16[32,32], index: 4, kind: input, shape index: {}]   ;;  %s1787_s5 = inlined_call_operand.vmem [shape: bf16[32,128], index: 5, kind: input, shape index: {}]   ;;  %s1788_s6 = inlined_call_operand.vmem [shape: bf16[128,32], index: 6, kind: input, shape index: {}]   ;;  %s1789_s7 = inlined_call_operand.vmem [shape: f32[10,128], index: 7, kind: input, shape index: {}]   ;;  %s1790_s8 = inlined_call_operand.hbm [shape: f32[2,32], index: 8, kind: output, shape index: {}]  }
   0x1   :  { %v1294_v0 = vld [vmem:[%s1784_s2 + $0x38] sm:$0xff]  ;;  %v1293_v2 = vld [vmem:[%s1784_s2 + $0x30] sm:$0xff]  ;;  %v1292_v4 = vld [vmem:[%s1784_s2 + $0x28] sm:$0xff] }
   0x2   :  { %v1298_v1 = vld [vmem:[%s1784_s2 + $0x58] sm:$0xff]  ;;  %154 = vmatpush.bf16.msra.mxu0 %v1294_v0  ;;  %v1297_v3 = vld [vmem:[%s1784_s2 + $0x50] sm:$0xff]  ;;  %v1296_v5 = vld [vmem:[%s1784_s2 + $0x48] sm:$0xff] }
   0x3   :  { %172 = vmatpush.bf16.msra.mxu1 %v1298_v1 }
   0x6   :  { %155 = vmatpush.bf16.msra.mxu0 %v1293_v2 }
   0x7   :  { %173 = vmatpush.bf16.msra.mxu1 %v1297_v3 }
   0x8   :  { %13 = vsyncpa [#allocation4], 0  ;;  %v1291_v6 = vld [vmem:[%s1784_s2 + $0x20] sm:$0xff]  ;;  %v1154_v9 = vld [vmem:[%s1782_s0 + $0x8] sm:$0x10]  ;;  %vm150_vm0 = vcmask 523264  }
   0x9   :  { %v1295_v7 = vld [vmem:[%s1784_s2 + $0x40] sm:$0xff]  ;;  %v1290_v10 = vld [vmem:[%s1784_s2 + $0x18] sm:$0xff]  ;;  %v1289_v12 = vld [vmem:[%s1784_s2 + $0x10] sm:$0xff]  ;;  %vm182_vm1 = vcmask 261120   ;;  %vm186_vm2 = vcmask 254976   ;;  %v1410_v30 = vmov 32.0  }
   0xa   :  { %156 = vmatpush.bf16.msra.mxu0 %v1292_v4  ;;  %v1285_v8 = vld [vmem:[%s1782_s0 + $0x4] sm:$0xf]  ;;  %v1288_v13 = vld [vmem:[%s1784_s2 + $0x8] sm:$0xff]  ;;  %v1152_v15 = vld [vmem:[%s1782_s0] sm:$0xf]  ;;  %1336 = vrcp.f32 %v1410_v30  ;;  %vm278_vm10 = vcmask 781312  }
   0xb   :  { %174 = vmatpush.bf16.msra.mxu1 %v1296_v5  ;;  %v1157_v11 = vor.u32 %v1285_v8, %v1154_v9  ;;  %v1287_v14 = vld [vmem:[%s1784_s2] sm:$0xff]  ;;  %v1286_v16 = vld [vmem:[%s1782_s0 + $0x4] sm:$0x10]  ;;  %vm280_vm11 = vcmask 778240   ;;  %s1411_s25 = smov 80   ;;  %s1412_s26 = smov 120  }
   0xc   :  { %v1153_v17 = vor.u32 %v1286_v16, %v1152_v15  ;;  %v67_v18 = vld [vmem:[%s1783_s1] sm:$0xff]  ;;  %v68_v24 = vld [vmem:[%s1783_s1 + $0x8] sm:$0x3]  ;;  %s1413_s27 = smov 88   ;;  %s1414_s28 = smov 96   ;;  %vm288_vm12 = vcmask 64512  }
   0xd   :  { %v1300_v47 = vld [vmem:[%s1785_s3 + $0x8] sm:$0xff]  ;;  %v1299_v49 = vld [vmem:[%s1785_s3] sm:$0xff]  ;;  %s1415_s29 = smov 112   ;;  %vm308_vm13 = vcmask 36864   ;;  %s1416_s30 = smov 56   ;;  %vm327_vm14 = vcmask 1041408  }
   0xe   :  { %157 = vmatpush.bf16.msra.mxu0 %v1291_v6  ;;  %268 = vmatpush.bf16.msra.mxu2 %v1300_v47  ;;  %v1326_v4 = vld [vmem:[%s1789_s7 + $0x2] ss:$0 sm:$0xff]  ;;  %v1327_v9 = vld [vmem:[%s1789_s7 + $0x3] ss:$0 sm:$0xff]  ;;  %vm328_vm15 = vcmask 1042432   ;;  %v1417_v47 = vmov 65535  }
   0xf   :  { %175 = vmatpush.bf16.msra.mxu1 %v1295_v7  ;;  %s1418_s9 = smov 48   ;;  %s1419_s10 = smov 64  }
  0x10   :  { %v1337_v31 = vpop.eup %1336  ;;  %s1420_s11 = smov 72   ;;  %s1421_s12 = smov 104  }
  0x11   :  { %v191_v32 = vmul.f32 32.0, %v1337_v31  ;;  %vm195_vm3 = vweird.f32 %v1337_v31  ;;  %s1422_s0 = smov 40   ;;  %s1423_s22 = smov [#allocation3]  }
  0x12   :  { %158 = vmatpush.bf16.msra.mxu0 %v1290_v10  ;;  %1206 = vmatmul.msk.bf16.vlgmr.msra.gmra.mxu1 %vm150_vm0, %v1157_v11  ;;  %vm410_vm0 = vcmask 1043456  }
  0x13   :  { %v192_v33 = vsub.f32 1.0, %v191_v32  ;;  %269 = vmatpush.bf16.msra.mxu2 %v1299_v49 }
  0x15   :  { %v193_v34 = vmul.f32 %v1337_v31, %v192_v33 }
  0x16   :  { %159 = vmatpush.bf16.msra.mxu0 %v1289_v12 }
  0x17   :  { %v194_v35 = vadd.f32 %v1337_v31, %v193_v34 }
  0x19   :  { %v1531_v36 = vsel %vm195_vm3, %v1337_v31, %v194_v35  ;;  %vm323_vm3 = vcmask 39936  }
  0x1a   :  { %160 = vmatpush.bf16.msra.mxu0 %v1288_v13 }
  0x1e   :  { %161 = vmatpush.bf16.msra.mxu0 %v1287_v14  ;;  %v1328_v14 = vld [vmem:[%s1789_s7 + $0x1] ss:$0 sm:$0xff] }
  0x21   :  { %162 = vmatmul.bf16.vlgmr.msra.gmra.mxu0 %v1153_v17 }
  0x8f   :  { %v177_v19 = vpop.f32.mrf.mxu1 }
  0x97   :  { %v179_v27 = vpop.f32.mrf.mxu1 }
  0x9e   :  { %v163_v20 = vpop.f32.mrf.mxu0 }
  0x9f   :  { %v164_v21 = vadd.f32 %v163_v20, %v67_v18 }
  0xa1   :  { %v1520_v22 = vadd.f32 %v177_v19, %v164_v21 }
  0xa3   :  { %v183_v23 = vsel %vm182_vm1, %v1520_v22, 0.0 }
  0xa4   :  { %184 = vadd.xlane.f32.xlu0 %v183_v23 }
  0xa6   :  { %v165_v25 = vpop.f32.mrf.mxu0 }
  0xa7   :  { %v166_v26 = vadd.f32 %v165_v25, %v68_v24 }
  0xa9   :  { %v1527_v28 = vadd.f32 %v179_v27, %v166_v26 }
  0xab   :  { %v187_v29 = vsel %vm186_vm2, %v1527_v28, 0.0 }
  0xac   :  { %188 = vadd.xlane.f32.xlu0 %v187_v29 }
 0x117   :  { %v185_v37 = vpop.xlane.xlu0 %184 }
 0x118   :  { %v197_v38 = vmul.f32 %v1531_v36, %v185_v37 }
 0x11a   :  { %v199_v39 = vsub.f32 %v1520_v22, %v197_v38 }
 0x11c   :  { %v201_v40 = vmul.f32 %v199_v39, %v199_v39 }
 0x11e   :  { %v203_v41 = vsel %vm182_vm1, %v201_v40, 0.0 }
 0x11f   :  { %204 = vadd.xlane.f32.xlu1 %v203_v41  ;;  %v189_v42 = vpop.xlane.xlu0 %188 }
 0x120   :  { %v198_v43 = vmul.f32 %v1531_v36, %v189_v42 }
 0x122   :  { %v200_v44 = vsub.f32 %v1527_v28, %v198_v43 }
 0x124   :  { %v202_v45 = vmul.f32 %v200_v44, %v200_v44 }
 0x126   :  { %v206_v46 = vsel %vm186_vm2, %v202_v45, 0.0 }
 0x127   :  { %207 = vadd.xlane.f32.xlu1 %v206_v46 }
 0x192   :  { %v205_v48 = vpop.xlane.xlu1 %204 }
 0x193   :  { %v209_v50 = vmul.f32 %v205_v48, %v1531_v36  ;;  %v329_v48 = vsel %vm327_vm14, 4294967295, %v1417_v47 }
 0x195   :  { %v211_v51 = vadd.f32 1e-06, %v209_v50 }
 0x197   :  { %1338 = vrsqrt.f32 %v211_v51  ;;  %vm219_vm5 = vweird.f32 %v211_v51 }
 0x19a   :  { %v208_v52 = vpop.xlane.xlu1 %207 }
 0x19b   :  { %v210_v53 = vmul.f32 %v208_v52, %v1531_v36 }
 0x19d   :  { %v1339_v54 = vpop.eup %1338  ;;  %v212_v55 = vadd.f32 1e-06, %v210_v53 }
 0x19e   :  { %v214_v56 = vmul.f32 %v1339_v54, %v211_v51  ;;  %vm220_vm4 = vweird.f32 %v1339_v54  ;;  %v1581_v51 = vsel %vm328_vm15, %v329_v48, 0 }
 0x19f   :  { %1340 = vrsqrt.f32 %v212_v55  ;;  %vm221_vm6 = vmor %vm219_vm5, %vm220_vm4  ;;  %vm229_vm8 = vweird.f32 %v212_v55  ;;  %vm912_vm4 = vcmask 1044480  }
 0x1a0   :  { %v215_v57 = vmul.f32 %v1339_v54, %v214_v56 }
 0x1a2   :  { %v216_v58 = vmul.f32 0.5, %v215_v57 }
 0x1a4   :  { %v217_v59 = vsub.f32 1.5, %v216_v58 }
 0x1a5   :  { %v1341_v60 = vpop.eup %1340 }
 0x1a6   :  { %v218_v61 = vmul.f32 %v1339_v54, %v217_v59  ;;  %v224_v62 = vmul.f32 %v1341_v60, %v212_v55  ;;  %vm230_vm7 = vweird.f32 %v1341_v60 }
 0x1a7   :  { %vm231_vm9 = vmor %vm229_vm8, %vm230_vm7 }
 0x1a8   :  { %v225_v63 = vmul.f32 %v1341_v60, %v224_v62  ;;  %v222_v0 = vsel %vm221_vm6, %v1339_v54, %v218_v61 }
 0x1a9   :  { %v233_v3 = vmul.f32 %v222_v0, %v199_v39 }
 0x1aa   :  { %v226_v1 = vmul.f32 0.5, %v225_v63 }
 0x1ab   :  { %v236_v8 = vmul.f32 %v1326_v4, %v233_v3 }
 0x1ac   :  { %v227_v2 = vsub.f32 1.5, %v226_v1 }
 0x1ad   :  { %v239_v11 = vadd.f32 %v1327_v9, %v236_v8 }
 0x1ae   :  { %v228_v5 = vmul.f32 %v1341_v60, %v227_v2 }
 0x1b0   :  { %v232_v6 = vsel %vm231_vm9, %v1341_v60, %v228_v5  ;;  %v348_v5 = vld [vmem:[%s1786_s4] sm:$0xf] }
 0x1b1   :  { %v234_v7 = vmul.f32 %v232_v6, %v200_v44  ;;  %v1604_v6 = vsel %vm410_vm0, %v348_v5, 0 }
 0x1b3   :  { %v237_v10 = vmul.f32 %v1326_v4, %v234_v7 }
 0x1b5   :  { %v240_v12 = vadd.f32 %v1327_v9, %v237_v10 }
 0x1b7   :  { %v241_v13 = vpack.c.bf16 %v240_v12, %v239_v11 }
 0x1b9   :  { %1215 = vmatmul.msk.bf16.vlgmr.msra.gmra.mxu2 %vm182_vm1, %v241_v13 }
 0x23c   :  { %v271_v15 = vpop.f32.mrf.mxu2 }
 0x23d   :  { %v272_v16 = vadd.f32 %v1328_v14, %v271_v15 }
 0x23f   :  { %v276_v17 = vpack.c.bf16 %v272_v16, %v272_v16 }
 0x241   :  { %279 = vst.msk [vmem:[#allocation2] sm:$0xf] %vm278_vm10, %v276_v17 }
 0x244   :  { %v273_v18 = vpop.f32.mrf.mxu2 }
 0x245   :  { %v274_v19 = vadd.f32 %v1328_v14, %v273_v18 }
 0x247   :  { %v277_v20 = vpack.c.bf16 %v274_v19, %v274_v19 }
 0x248   :  { %v282_v21 = vld [vmem:[#allocation2] sm:$0x7] }
 0x249   :  { %v284_v23 = vunpack.c.l.b16 %v282_v21  ;;  %281 = vst.msk [vmem:[#allocation2 + $0x4] sm:$0x1] %vm280_vm11, %v277_v20  ;;  %v1230_v60 = vld [vmem:[#allocation2] sm:$0xc] }
 0x24b   :  { %v1557_v24 = vpack.c.b16 %v284_v23, %v284_v23 }
 0x24d   :  { %448 = vrot.lane.b32.xlu1 %v1557_v24, %s1411_s25  ;;  %349 = vrot.lane.b32.xlu0 %v1557_v24, %s1412_s26 }
 0x24e   :  { %351 = vrot.lane.b32.xlu2 %v1557_v24, %s1413_s27 }
 0x250   :  { %v1301_v59 = vld [vmem:[#allocation2] sm:$0x10] }
 0x251   :  { %v1231_v61 = vor.u32 %v1301_v59, %v1230_v60 }
 0x253   :  { %v610_v62 = vshrl.u32 %v1231_v61, 16  ;;  %v613_v63 = vshll.u32 %v1231_v61, 16 }
 0x255   :  { %v612_v0 = vrot.slane %v610_v62, 2  ;;  %v615_v1 = vrot.slane %v613_v63, 3 }
 0x256   :  { %286 = vrot.lane.b32.xlu2 %v1557_v24, %s1414_s28 }
 0x257   :  { %v1590_v2 = vor.u32 %v615_v1, %v612_v0 }
 0x25e   :  { %446 = vrot.lane.b32.xlu2 %v1557_v24, %s1415_s29 }
 0x2a8   :  { %v352_v25 = vpop.permute.xlu2 %351 }
 0x2a9   :  { %v357_v26 = vsel %vm288_vm12, %v352_v25, 0 }
 0x2aa   :  { %366 = vmatpush.bf16.xpose.msra.mxu3 %v357_v26  ;;  %v406_v26 = vld [vmem:[%s1786_s4 + $0x4] sm:$0xf] }
 0x2b0   :  { %v287_v27 = vpop.permute.xlu2 %286 }
 0x2b1   :  { %v293_v29 = vsel %vm288_vm12, %v287_v27, 0  ;;  %v412_v27 = vsel %vm410_vm0, %v406_v26, 0 }
 0x2b2   :  { %302 = vmatpush.bf16.xpose.msrb.mxu0 %v293_v29  ;;  %440 = vmatpush.bf16.msrb.mxu3 %v1604_v6 }
 0x2b8   :  { %v447_v33 = vpop.permute.xlu2 %446 }
 0x2b9   :  { %1216 = vmatmul.msk.bf16.vlgmr.msrb.gmra.mxu0 %vm288_vm12, %v282_v21 }
 0x2bf   :  { %v449_v30 = vpop.permute.xlu1 %448  ;;  %v350_v31 = vpop.permute.xlu0 %349 }
 0x2c0   :  { %v454_v32 = vsel %vm288_vm12, %v449_v30, 0  ;;  %1218 = vmatmul.msk.bf16.vlgmr.msra.gmra.mxu3 %vm288_vm12, %v350_v31 }
 0x2c1   :  { %463 = vmatpush.bf16.xpose.msra.mxu0 %v454_v32 }
 0x2c9   :  { %1222 = vmatmul.msk.bf16.vlgmr.msra.gmra.mxu0 %vm288_vm12, %v447_v33  ;;  %v503_v33 = vld [vmem:[%s1786_s4 + $0x8] sm:$0xf] }
 0x336   :  { %v1575_v34 = vpop.f32.mrf.mxu0 }
 0x337   :  { %v309_v58 = vsel %vm308_vm13, %v1575_v34, -inf }
 0x33e   :  { %v306_v35 = vpop.f32.mrf.mxu0 }
 0x343   :  { %v368_v37 = vpop.f32.mrf.mxu3 }
 0x344   :  { %v372_v38 = vsel %vm308_vm13, %v368_v37, -inf }
 0x345   :  { %373 = vmax.xlane.f32.xlu2 %v372_v38 }
 0x346   :  { %v465_v39 = vpop.f32.mrf.mxu0 }
 0x347   :  { %v469_v40 = vsel %vm308_vm13, %v465_v39, -inf }
 0x348   :  { %470 = vmax.xlane.f32.xlu0 %v469_v40 }
 0x34b   :  { %v370_v41 = vpop.f32.mrf.mxu3 }
 0x34e   :  { %v467_v42 = vpop.f32.mrf.mxu0 }
 0x35d   :  { %384 = vrot.lane.b32.xlu2 %v1557_v24, %s1416_s30 }
 0x3b8   :  { %v374_v43 = vpop.xlane.xlu2 %373 }
 0x3b9   :  { %v375_v44 = vsub.f32 %v368_v37, %v374_v43  ;;  %v508_v37 = vsel %vm410_vm0, %v503_v33, 0 }
 0x3bb   :  { %v376_v45 = vmul.f32 1.442695, %v375_v44  ;;  %v471_v46 = vpop.xlane.xlu0 %470 }
 0x3bc   :  { %v472_v49 = vsub.f32 %v465_v39, %v471_v46 }
 0x3bd   :  { %1342 = vpow2.f32 %v376_v45 }
 0x3be   :  { %v473_v50 = vmul.f32 1.442695, %v472_v49 }
 0x3c0   :  { %1344 = vpow2.f32 %v473_v50  ;;  %v385_v52 = vpop.permute.xlu2 %384 }
 0x3c1   :  { %v390_v53 = vand.u32 %v385_v52, %v1581_v51 }
 0x3c3   :  { %v1343_v54 = vpop.eup %1342  ;;  %399 = vmatpush.bf16.msrb.mxu1 %v390_v53 }
 0x3c4   :  { %v378_v55 = vsel %vm308_vm13, %v1343_v54, 0.0 }
 0x3c5   :  { %379 = vadd.xlane.f32.xlu1 %v378_v55 }
 0x3c6   :  { %v1345_v56 = vpop.eup %1344 }
 0x3c7   :  { %v475_v57 = vsel %vm308_vm13, %v1345_v56, 0.0 }
 0x3c8   :  { %476 = vadd.xlane.f32.xlu0 %v475_v57 }
 0x3d0   :  { %310 = vmax.xlane.f32.xlu0 %v309_v58 }
 0x3de   :  { %481 = vrot.lane.b32.xlu1 %v1557_v24, %s1418_s9 }
 0x3e4   :  { %321 = vrot.lane.b32.xlu0 %v1557_v24, %s1419_s10 }
 0x3e6   :  { %617 = vrot.lane.b32.xlu1 %v1590_v2, %s1414_s28 }
 0x3ec   :  { %526 = vrot.lane.b32.xlu0 %v1557_v24, %s1420_s11 }
 0x3ee   :  { %524 = vrot.lane.b32.xlu1 %v1557_v24, %s1421_s12 }
 0x438   :  { %v380_v3 = vpop.xlane.xlu1 %379 }
 0x439   :  { %1346 = vrcp.f32 %v380_v3 }
 0x43b   :  { %v477_v4 = vpop.xlane.xlu0 %476 }
 0x43c   :  { %1348 = vrcp.f32 %v477_v4 }
 0x43f   :  { %v1347_v7 = vpop.eup %1346 }
 0x440   :  { %v382_v8 = vmul.f32 %v1347_v7, %v1343_v54 }
 0x442   :  { %v383_v9 = vpack.c.bf16 %v382_v8, %v382_v8  ;;  %v1349_v13 = vpop.eup %1348 }
 0x443   :  { %v311_v10 = vpop.xlane.xlu0 %310  ;;  %v479_v16 = vmul.f32 %v1349_v13, %v1345_v56 }
 0x444   :  { %v312_v11 = vsub.f32 %v1575_v34, %v311_v10  ;;  %1219 = vmatmul.msk.bf16.vlgmr.msrb.gmra.mxu1 %vm323_vm3, %v383_v9 }
 0x445   :  { %v480_v19 = vpack.c.bf16 %v479_v16, %v479_v16 }
 0x446   :  { %v313_v12 = vmul.f32 1.442695, %v312_v11 }
 0x448   :  { %1350 = vpow2.f32 %v313_v12 }
 0x44e   :  { %v1351_v14 = vpop.eup %1350 }
 0x44f   :  { %v315_v15 = vsel %vm308_vm13, %v1351_v14, 0.0 }
 0x450   :  { %316 = vadd.xlane.f32.xlu2 %v315_v15  ;;  %v482_v17 = vpop.permute.xlu1 %481 }
 0x451   :  { %v487_v18 = vand.u32 %v482_v17, %v1581_v51 }
 0x453   :  { %496 = vmatpush.bf16.msra.mxu1 %v487_v18 }
 0x456   :  { %v322_v20 = vpop.permute.xlu0 %321  ;;  %1223 = vmatmul.msk.bf16.vlgmr.msra.gmra.mxu1 %vm323_vm3, %v480_v19 }
 0x457   :  { %v332_v21 = vand.u32 %v1581_v51, %v322_v20 }
 0x458   :  { %v618_v40 = vpop.permute.xlu1 %617 }
 0x459   :  { %341 = vmatpush.bf16.msrb.mxu2 %v332_v21  ;;  %v623_v42 = vsel %vm288_vm12, %v618_v40, 0 }
 0x45d   :  { %421 = vmatpush.bf16.msra.mxu2 %v412_v27 }
 0x45e   :  { %v527_v23 = vpop.permute.xlu0 %526 }
 0x45f   :  { %v532_v25 = vsel %vm288_vm12, %v527_v23, 0 }
 0x460   :  { %541 = vmatpush.bf16.xpose.msra.mxu3 %v532_v25  ;;  %v525_v50 = vpop.permute.xlu1 %524 }
 0x468   :  { %650 = vrot.lane.b32.xlu2 %v1590_v2, %s1419_s10 }
 0x4c1   :  { %v401_v29 = vpop.f32.mrf.mxu1 }
 0x4c2   :  { %v405_v41 = vpack.c.bf16 %v401_v29, %v401_v29 }
 0x4c3   :  { %v317_v30 = vpop.xlane.xlu2 %316 }
 0x4c4   :  { %1352 = vrcp.f32 %v317_v30 }
 0x4c9   :  { %v403_v31 = vpop.f32.mrf.mxu1 }
 0x4ca   :  { %v1353_v32 = vpop.eup %1352 }
 0x4cb   :  { %v319_v34 = vmul.f32 %v1353_v32, %v1351_v14  ;;  %v651_v44 = vpop.permute.xlu2 %650 }
 0x4cc   :  { %v656_v47 = vand.u32 %v651_v44, %v1581_v51 }
 0x4cd   :  { %v320_v35 = vpack.c.bf16 %v319_v34, %v319_v34  ;;  %v581_v34 = vld [vmem:[%s1786_s4 + $0xc] sm:$0xf] }
 0x4cf   :  { %1217 = vmatmul.msk.bf16.vlgmr.msrb.gmra.mxu2 %vm323_vm3, %v320_v35  ;;  %v1672_v35 = vsel %vm410_vm0, %v581_v34, 0 }
 0x4d0   :  { %517 = vmatpush.bf16.msrb.mxu2 %v508_v37  ;;  %595 = vmatpush.bf16.msrb.mxu1 %v1672_v35 }
 0x4d3   :  { %v498_v38 = vpop.f32.mrf.mxu1 }
 0x4d4   :  { %v502_v43 = vpack.c.bf16 %v498_v38, %v498_v38 }
 0x4db   :  { %v500_v39 = vpop.f32.mrf.mxu1 }
 0x4df   :  { %1220 = vmatmul.msk.bf16.vlgmr.msra.gmra.mxu2 %vm288_vm12, %v405_v41 }
 0x4e0   :  { %632 = vmatpush.bf16.xpose.msra.mxu2 %v623_v42 }
 0x4ef   :  { %1224 = vmatmul.msk.bf16.vlgmr.msrb.gmra.mxu2 %vm288_vm12, %v502_v43 }
 0x4f0   :  { %739 = vmatpush.bf16.msrb.mxu2 %v412_v27 }
 0x4ff   :  { %1232 = vmatmul.msk.bf16.vlgmr.msra.gmra.mxu2 %vm288_vm12, %v1590_v2 }
 0x500   :  { %828 = vmatpush.bf16.msra.mxu2 %v508_v37 }
 0x552   :  { %v343_v45 = vpop.f32.mrf.mxu2 }
 0x553   :  { %v347_v46 = vpack.c.bf16 %v343_v45, %v343_v45 }
 0x555   :  { %1221 = vmatmul.msk.bf16.vlgmr.msrb.gmra.mxu3 %vm288_vm12, %v347_v46 }
 0x556   :  { %665 = vmatpush.bf16.msrb.mxu3 %v656_v47 }
 0x55a   :  { %v345_v48 = vpop.f32.mrf.mxu2 }
 0x562   :  { %v1632_v49 = vpop.f32.mrf.mxu2 }
 0x565   :  { %1225 = vmatmul.msk.bf16.vlgmr.msra.gmra.mxu3 %vm288_vm12, %v525_v50 }
 0x566   :  { %755 = vmatpush.bf16.msra.mxu3 %v1604_v6 }
 0x56a   :  { %v425_v52 = vpop.f32.mrf.mxu2 }
 0x572   :  { %v1636_v53 = vpop.f32.mrf.mxu2 }
 0x57a   :  { %v521_v54 = vpop.f32.mrf.mxu2 }
 0x582   :  { %v634_v55 = vpop.f32.mrf.mxu2 }
 0x583   :  { %v638_v56 = vsel %vm308_vm13, %v634_v55, -inf }
 0x584   :  { %639 = vmax.xlane.f32.xlu0 %v638_v56 }
 0x58a   :  { %v636_v57 = vpop.f32.mrf.mxu2 }
 0x5d8   :  { %v1639_v58 = vpop.f32.mrf.mxu3 }
 0x5d9   :  { %v443_v54 = vadd.f32 %v1639_v58, %v1632_v49 }
 0x5e0   :  { %v444_v59 = vpop.f32.mrf.mxu3 }
 0x5e8   :  { %v543_v60 = vpop.f32.mrf.mxu3 }
 0x5e9   :  { %v547_v61 = vsel %vm308_vm13, %v543_v60, -inf }
 0x5ea   :  { %548 = vmax.xlane.f32.xlu2 %v547_v61 }
 0x5f0   :  { %v545_v62 = vpop.f32.mrf.mxu3 }
 0x5f7   :  { %v640_v63 = vpop.xlane.xlu0 %639 }
 0x5f8   :  { %v641_v0 = vsub.f32 %v634_v55, %v640_v63  ;;  %v523_v55 = vadd.f32 %v1636_v53, %v443_v54 }
 0x5fa   :  { %v642_v1 = vmul.f32 1.442695, %v641_v0 }
 0x5fc   :  { %1354 = vpow2.f32 %v642_v1 }
 0x602   :  { %v1355_v3 = vpop.eup %1354  ;;  %837 = vrot.lane.b32.xlu2 %v1590_v2, %s1420_s11 }
 0x603   :  { %v644_v4 = vsel %vm308_vm13, %v1355_v3, 0.0 }
 0x604   :  { %645 = vadd.xlane.f32.xlu1 %v644_v4 }
 0x61d   :  { %559 = vrot.lane.b32.xlu1 %v1557_v24, %s1422_s0 }
 0x625   :  { %672 = vrot.lane.b32.xlu1 %v1590_v2, %s1412_s26 }
 0x62d   :  { %761 = vrot.lane.b32.xlu1 %v1590_v2, %s1415_s29 }
 0x65d   :  { %v549_v5 = vpop.xlane.xlu2 %548 }
 0x65e   :  { %v550_v6 = vsub.f32 %v543_v60, %v549_v5 }
 0x660   :  { %v551_v7 = vmul.f32 1.442695, %v550_v6 }
 0x662   :  { %1356 = vpow2.f32 %v551_v7 }
 0x665   :  { %v838_v12 = vpop.permute.xlu2 %837 }
 0x666   :  { %v843_v14 = vsel %vm288_vm12, %v838_v12, 0 }
 0x668   :  { %v1357_v8 = vpop.eup %1356 }
 0x669   :  { %v553_v9 = vsel %vm308_vm13, %v1357_v8, 0.0 }
 0x66a   :  { %554 = vadd.xlane.f32.xlu0 %v553_v9 }
 0x677   :  { %v646_v10 = vpop.xlane.xlu1 %645 }
 0x678   :  { %1358 = vrcp.f32 %v646_v10 }
 0x67e   :  { %v1359_v11 = vpop.eup %1358  ;;  %674 = vrot.lane.b32.xlu0 %v1590_v2, %s1413_s27 }
 0x67f   :  { %v648_v24 = vmul.f32 %v1359_v11, %v1355_v3 }
 0x681   :  { %v649_v13 = vpack.c.bf16 %v648_v24, %v648_v24 }
 0x683   :  { %1233 = vmatmul.msk.bf16.vlgmr.msrb.gmra.mxu3 %vm323_vm3, %v649_v13 }
 0x684   :  { %852 = vmatpush.bf16.xpose.msrb.mxu3 %v843_v14 }
 0x686   :  { %763 = vrot.lane.b32.xlu0 %v1590_v2, %s1411_s25  ;;  %s1141_s25 = sshll.u32 %s1790_s8, 4  ;;  %s1142_s25 = int_to_ptr.hbm [resolvable:$true] %s1141_s25 }
 0x68e   :  { %835 = vrot.lane.b32.xlu0 %v1590_v2, %s1421_s12 }
 0x68f   :  { %v560_v15 = vpop.permute.xlu1 %559 }
 0x690   :  { %v565_v16 = vand.u32 %v560_v15, %v1581_v51 }
 0x692   :  { %574 = vmatpush.bf16.msrb.mxu0 %v565_v16 }
 0x697   :  { %v673_v25 = vpop.permute.xlu1 %672 }
 0x69f   :  { %v762_v31 = vpop.permute.xlu1 %761 }
 0x6dd   :  { %v555_v17 = vpop.xlane.xlu0 %554 }
 0x6de   :  { %1360 = vrcp.f32 %v555_v17 }
 0x6e4   :  { %v1361_v18 = vpop.eup %1360 }
 0x6e5   :  { %v557_v19 = vmul.f32 %v1361_v18, %v1357_v8 }
 0x6e7   :  { %v558_v20 = vpack.c.bf16 %v557_v19, %v557_v19 }
 0x6e9   :  { %1226 = vmatmul.msk.bf16.vlgmr.msrb.gmra.mxu0 %vm323_vm3, %v558_v20 }
 0x6f0   :  { %v675_v21 = vpop.permute.xlu0 %674 }
 0x6f1   :  { %v680_v23 = vsel %vm288_vm12, %v675_v21, 0 }
 0x6f2   :  { %689 = vmatpush.bf16.xpose.msra.mxu0 %v680_v23 }
 0x6f8   :  { %v764_v26 = vpop.permute.xlu0 %763 }
 0x6f9   :  { %v769_v27 = vsel %vm288_vm12, %v764_v26, 0  ;;  %1234 = vmatmul.msk.bf16.vlgmr.msra.gmra.mxu0 %vm288_vm12, %v673_v25 }
 0x6fa   :  { %778 = vmatpush.bf16.xpose.msrb.mxu0 %v769_v27 }
 0x700   :  { %v836_v33 = vpop.permute.xlu0 %835 }
 0x706   :  { %v667_v29 = vpop.f32.mrf.mxu3 }
 0x707   :  { %v671_v30 = vpack.c.bf16 %v667_v29, %v667_v29 }
 0x709   :  { %1237 = vmatmul.msk.bf16.vlgmr.msra.gmra.mxu3 %vm288_vm12, %v671_v30  ;;  %1238 = vmatmul.msk.bf16.vlgmr.msrb.gmra.mxu0 %vm288_vm12, %v762_v31 }
 0x70e   :  { %v669_v32 = vpop.f32.mrf.mxu3 }
 0x719   :  { %1241 = vmatmul.msk.bf16.vlgmr.msrb.gmra.mxu3 %vm288_vm12, %v836_v33 }
 0x766   :  { %v576_v37 = vpop.f32.mrf.mxu0 }
 0x767   :  { %v580_v38 = vpack.c.bf16 %v576_v37, %v576_v37 }
 0x769   :  { %1227 = vmatmul.msk.bf16.vlgmr.msrb.gmra.mxu1 %vm288_vm12, %v580_v38 }
 0x76e   :  { %v578_v39 = vpop.f32.mrf.mxu0 }
 0x776   :  { %v691_v40 = vpop.f32.mrf.mxu0 }
 0x777   :  { %v695_v41 = vsel %vm308_vm13, %v691_v40, -inf }
 0x778   :  { %696 = vmax.xlane.f32.xlu1 %v695_v41 }
 0x77e   :  { %v693_v42 = vpop.f32.mrf.mxu0 }
 0x786   :  { %v780_v43 = vpop.f32.mrf.mxu0 }
 0x787   :  { %v784_v44 = vsel %vm308_vm13, %v780_v43, -inf }
 0x788   :  { %785 = vmax.xlane.f32.xlu0 %v784_v44 }
 0x78c   :  { %v1678_v45 = vpop.f32.mrf.mxu3 }
 0x78e   :  { %v782_v46 = vpop.f32.mrf.mxu0 }
 0x794   :  { %v759_v47 = vpop.f32.mrf.mxu3 }
 0x795   :  { %v1329_v47 = vld [vmem:[%s1789_s7 + $0x4] ss:$0 sm:$0xff] }
 0x79c   :  { %707 = vrot.lane.b32.xlu0 %v1590_v2, %s1416_s30  ;;  %v854_v48 = vpop.f32.mrf.mxu3 }
 0x79d   :  { %v858_v50 = vsel %vm308_vm13, %v854_v48, -inf }
 0x79e   :  { %859 = vmax.xlane.f32.xlu2 %v858_v50 }
 0x7a4   :  { %870 = vrot.lane.b32.xlu0 %v1590_v2, %s1422_s0  ;;  %v856_v52 = vpop.f32.mrf.mxu3 }
 0x7b6   :  { %796 = vrot.lane.b32.xlu2 %v1590_v2, %s1418_s9 }
 0x7e6   :  { %v597_v56 = vpop.f32.mrf.mxu1 }
 0x7e7   :  { %v1690_v57 = vadd.f32 %v597_v56, %v523_v55 }
 0x7eb   :  { %v697_v59 = vpop.xlane.xlu1 %696 }
 0x7ec   :  { %v698_v60 = vsub.f32 %v691_v40, %v697_v59 }
 0x7ee   :  { %v699_v61 = vmul.f32 1.442695, %v698_v60  ;;  %v599_v62 = vpop.f32.mrf.mxu1 }
 0x7f0   :  { %1362 = vpow2.f32 %v699_v61 }
 0x7f6   :  { %v1363_v63 = vpop.eup %1362 }
 0x7f7   :  { %v701_v0 = vsel %vm308_vm13, %v1363_v63, 0.0 }
 0x7f8   :  { %702 = vadd.xlane.f32.xlu1 %v701_v0 }
 0x7fb   :  { %v786_v1 = vpop.xlane.xlu0 %785 }
 0x7fc   :  { %v787_v3 = vsub.f32 %v780_v43, %v786_v1 }
 0x7fe   :  { %v788_v2 = vmul.f32 1.442695, %v787_v3 }
 0x800   :  { %1364 = vpow2.f32 %v788_v2  ;;  %v1303_v2 = vld [vmem:[%s1787_s5 + $0x8] sm:$0xff] }
 0x806   :  { %v1365_v4 = vpop.eup %1364 }
 0x807   :  { %v790_v49 = vsel %vm308_vm13, %v1365_v4, 0.0 }
 0x808   :  { %791 = vadd.xlane.f32.xlu1 %v790_v49 }
 0x80e   :  { %v708_v53 = vpop.permute.xlu0 %707 }
 0x80f   :  { %v713_v58 = vand.u32 %v708_v53, %v1581_v51 }
 0x811   :  { %722 = vmatpush.bf16.msra.mxu1 %v713_v58  ;;  %v860_v5 = vpop.xlane.xlu2 %859 }
 0x812   :  { %v861_v6 = vsub.f32 %v854_v48, %v860_v5 }
 0x814   :  { %v862_v7 = vmul.f32 1.442695, %v861_v6 }
 0x816   :  { %1366 = vpow2.f32 %v862_v7  ;;  %v871_v8 = vpop.permute.xlu0 %870 }
 0x817   :  { %v876_v9 = vand.u32 %v871_v8, %v1581_v51 }
 0x819   :  { %885 = vmatpush.bf16.msra.mxu0 %v876_v9  ;;  %v797_v10 = vpop.permute.xlu2 %796 }
 0x81a   :  { %v802_v11 = vand.u32 %v797_v10, %v1581_v51 }
 0x81c   :  { %v1367_v24 = vpop.eup %1366  ;;  %811 = vmatpush.bf16.msrb.mxu1 %v802_v11 }
 0x81d   :  { %v864_v12 = vsel %vm308_vm13, %v1367_v24, 0.0 }
 0x81e   :  { %865 = vadd.xlane.f32.xlu1 %v864_v12 }
 0x86b   :  { %v703_v13 = vpop.xlane.xlu1 %702 }
 0x86c   :  { %1368 = vrcp.f32 %v703_v13 }
 0x872   :  { %v1369_v14 = vpop.eup %1368 }
 0x873   :  { %v705_v15 = vmul.f32 %v1369_v14, %v1363_v63 }
 0x875   :  { %v706_v16 = vpack.c.bf16 %v705_v15, %v705_v15 }
 0x877   :  { %1235 = vmatmul.msk.bf16.vlgmr.msra.gmra.mxu1 %vm323_vm3, %v706_v16 }
 0x878   :  { %902 = vmatpush.bf16.msra.mxu1 %v1672_v35 }
 0x87b   :  { %v792_v17 = vpop.xlane.xlu1 %791 }
 0x87c   :  { %1370 = vrcp.f32 %v792_v17 }
 0x882   :  { %v1371_v18 = vpop.eup %1370 }
 0x883   :  { %v794_v19 = vmul.f32 %v1371_v18, %v1365_v4  ;;  %v1302_v4 = vld [vmem:[%s1787_s5] sm:$0xff]  ;;  %s1139_s5 = sshll.u32 %s1423_s22, 4  ;;  %s1140_s5 = int_to_ptr.vmem [resolvable:$true] %s1139_s5 }
 0x884   :  { %v1330_v18 = vld [vmem:[%s1789_s7 + $0x5] ss:$0 sm:$0xff] }
 0x885   :  { %v795_v20 = vpack.c.bf16 %v794_v19, %v794_v19 }
 0x887   :  { %1239 = vmatmul.msk.bf16.vlgmr.msrb.gmra.mxu1 %vm323_vm3, %v795_v20 }
 0x891   :  { %v866_v51 = vpop.xlane.xlu1 %865 }
 0x892   :  { %1372 = vrcp.f32 %v866_v51  ;;  %v1331_v51 = vld [vmem:[%s1789_s7 + $0x6] ss:$0 sm:$0xff] }
 0x898   :  { %v1373_v21 = vpop.eup %1372 }
 0x899   :  { %v868_v23 = vmul.f32 %v1373_v21, %v1367_v24 }
 0x89b   :  { %v869_v25 = vpack.c.bf16 %v868_v23, %v868_v23 }
 0x89d   :  { %1242 = vmatmul.msk.bf16.vlgmr.msra.gmra.mxu0 %vm323_vm3, %v869_v25 }
 0x8f4   :  { %v724_v26 = vpop.f32.mrf.mxu1 }
 0x8f5   :  { %v728_v27 = vpack.c.bf16 %v724_v26, %v724_v26 }
 0x8f7   :  { %1236 = vmatmul.msk.bf16.vlgmr.msrb.gmra.mxu2 %vm288_vm12, %v728_v27 }
 0x8f8   :  { %996 = vmatpush.bf16.msrb.mxu2 %v1303_v2 }
 0x8fc   :  { %v726_v29 = vpop.f32.mrf.mxu1  ;;  %997 = vmatpush.bf16.msrb.mxu2 %v1302_v4  ;;  %v1333_v4 = vld [vmem:[%s1789_s7 + $0x7] ss:$0 sm:$0xff] }
 0x904   :  { %v813_v30 = vpop.f32.mrf.mxu1 }
 0x905   :  { %v817_v31 = vpack.c.bf16 %v813_v30, %v813_v30 }
 0x907   :  { %1240 = vmatmul.msk.bf16.vlgmr.msra.gmra.mxu2 %vm288_vm12, %v817_v31 }
 0x90c   :  { %v815_v32 = vpop.f32.mrf.mxu1 }
 0x90d   :  { %v1311_v32 = vld [vmem:[%s1788_s6 + $0x38] sm:$0xff] }
 0x90e   :  { %1088 = vmatpush.bf16.msra.mxu3 %v1311_v32 }
 0x91a   :  { %v887_v33 = vpop.f32.mrf.mxu0 }
 0x91b   :  { %v891_v34 = vpack.c.bf16 %v887_v33, %v887_v33  ;;  %v1310_v33 = vld [vmem:[%s1788_s6 + $0x30] sm:$0xff] }
 0x91c   :  { %1089 = vmatpush.bf16.msra.mxu3 %v1310_v33 }
 0x91d   :  { %1243 = vmatmul.msk.bf16.vlgmr.msra.gmra.mxu1 %vm288_vm12, %v891_v34  ;;  %v1309_v34 = vld [vmem:[%s1788_s6 + $0x28] sm:$0xff] }
 0x920   :  { %1090 = vmatpush.bf16.msra.mxu3 %v1309_v34 }
 0x922   :  { %v889_v35 = vpop.f32.mrf.mxu0 }
 0x923   :  { %v1308_v35 = vld [vmem:[%s1788_s6 + $0x20] sm:$0xff] }
 0x924   :  { %1091 = vmatpush.bf16.msra.mxu3 %v1308_v35 }
 0x97a   :  { %v741_v37 = vpop.f32.mrf.mxu2 }
 0x97b   :  { %v758_v41 = vadd.f32 %v1678_v45, %v741_v37  ;;  %v1307_v37 = vld [vmem:[%s1788_s6 + $0x18] sm:$0xff] }
 0x97c   :  { %1092 = vmatpush.bf16.msra.mxu3 %v1307_v37 }
 0x982   :  { %v743_v38 = vpop.f32.mrf.mxu2 }
 0x983   :  { %v1306_v38 = vld [vmem:[%s1788_s6 + $0x10] sm:$0xff] }
 0x984   :  { %1093 = vmatpush.bf16.msra.mxu3 %v1306_v38 }
 0x98a   :  { %v830_v39 = vpop.f32.mrf.mxu2 }
 0x98b   :  { %v834_v42 = vadd.f32 %v830_v39, %v758_v41  ;;  %v1305_v39 = vld [vmem:[%s1788_s6 + $0x8] sm:$0xff]  ;;  %v1332_v41 = vld [vmem:[%s1789_s7] ss:$0 sm:$0xff] }
 0x98c   :  { %1094 = vmatpush.bf16.msra.mxu3 %v1305_v39 }
 0x992   :  { %v832_v40 = vpop.f32.mrf.mxu2 }
 0x993   :  { %v1304_v40 = vld [vmem:[%s1788_s6] sm:$0xff] }
 0x994   :  { %1095 = vmatpush.bf16.msra.mxu3 %v1304_v40 }
 0x99a   :  { %v904_v43 = vpop.f32.mrf.mxu1 }
 0x99b   :  { %v908_v44 = vadd.f32 %v904_v43, %v834_v42 }
 0x99d   :  { %v910_v46 = vrot.slane %v908_v44, 3 }
 0x99f   :  { %v913_v48 = vsel %vm912_vm4, %v1690_v57, %v910_v46  ;;  %v915_v50 = vadd.f32 %v910_v46, %v1527_v28 }
 0x9a0   :  { %v914_v52 = vadd.f32 %v913_v48, %v1520_v22 }
 0x9a1   :  { %v918_v54 = vadd.f32 %v1329_v47, %v915_v50 }
 0x9a2   :  { %v906_v55 = vpop.f32.mrf.mxu1  ;;  %v1712_v56 = vadd.f32 %v1329_v47, %v914_v52 }
 0x9a3   :  { %v922_v45 = vsel %vm186_vm2, %v918_v54, 0.0 }
 0x9a4   :  { %923 = vadd.xlane.f32.xlu0 %v922_v45  ;;  %v919_v59 = vsel %vm182_vm1, %v1712_v56, 0.0 }
 0x9a5   :  { %920 = vadd.xlane.f32.xlu1 %v919_v59 }
 0xa17   :  { %v924_v60 = vpop.xlane.xlu0 %923 }
 0xa18   :  { %v926_v61 = vmul.f32 %v924_v60, %v1531_v36  ;;  %v921_v62 = vpop.xlane.xlu1 %920 }
 0xa19   :  { %v925_v57 = vmul.f32 %v921_v62, %v1531_v36 }
 0xa1a   :  { %v928_v28 = vsub.f32 %v918_v54, %v926_v61 }
 0xa1b   :  { %v927_v22 = vsub.f32 %v1712_v56, %v925_v57 }
 0xa1c   :  { %v930_v63 = vmul.f32 %v928_v28, %v928_v28 }
 0xa1d   :  { %v929_v0 = vmul.f32 %v927_v22, %v927_v22 }
 0xa1e   :  { %v934_v1 = vsel %vm186_vm2, %v930_v63, 0.0 }
 0xa1f   :  { %935 = vadd.xlane.f32.xlu2 %v934_v1  ;;  %v931_v3 = vsel %vm182_vm1, %v929_v0, 0.0 }
 0xa20   :  { %932 = vadd.xlane.f32.xlu1 %v931_v3 }
 0xa92   :  { %v936_v49 = vpop.xlane.xlu2 %935 }
 0xa93   :  { %v938_v53 = vmul.f32 %v936_v49, %v1531_v36  ;;  %v933_v58 = vpop.xlane.xlu1 %932 }
 0xa94   :  { %v937_v5 = vmul.f32 %v933_v58, %v1531_v36 }
 0xa95   :  { %v940_v6 = vadd.f32 1e-06, %v938_v53 }
 0xa96   :  { %v939_v7 = vadd.f32 1e-06, %v937_v5 }
 0xa97   :  { %1374 = vrsqrt.f32 %v940_v6  ;;  %vm957_vm7 = vweird.f32 %v940_v6 }
 0xa98   :  { %1376 = vrsqrt.f32 %v939_v7  ;;  %vm947_vm9 = vweird.f32 %v939_v7 }
 0xa9d   :  { %v1375_v8 = vpop.eup %1374 }
 0xa9e   :  { %v1377_v9 = vpop.eup %1376  ;;  %v952_v10 = vmul.f32 %v1375_v8, %v940_v6  ;;  %vm958_vm5 = vweird.f32 %v1375_v8 }
 0xa9f   :  { %v942_v11 = vmul.f32 %v1377_v9, %v939_v7  ;;  %vm948_vm6 = vweird.f32 %v1377_v9  ;;  %vm959_vm8 = vmor %vm957_vm7, %vm958_vm5 }
 0xaa0   :  { %v953_v24 = vmul.f32 %v1375_v8, %v952_v10  ;;  %vm949_vm10 = vmor %vm947_vm9, %vm948_vm6 }
 0xaa1   :  { %v943_v12 = vmul.f32 %v1377_v9, %v942_v11 }
 0xaa2   :  { %v954_v13 = vmul.f32 0.5, %v953_v24 }
 0xaa3   :  { %v944_v14 = vmul.f32 0.5, %v943_v12 }
 0xaa4   :  { %v955_v15 = vsub.f32 1.5, %v954_v13 }
 0xaa5   :  { %v945_v16 = vsub.f32 1.5, %v944_v14 }
 0xaa6   :  { %v956_v17 = vmul.f32 %v1375_v8, %v955_v15 }
 0xaa7   :  { %v946_v19 = vmul.f32 %v1377_v9, %v945_v16 }
 0xaa8   :  { %v960_v20 = vsel %vm959_vm8, %v1375_v8, %v956_v17 }
 0xaa9   :  { %v962_v21 = vmul.f32 %v960_v20, %v928_v28  ;;  %v950_v23 = vsel %vm949_vm10, %v1377_v9, %v946_v19 }
 0xaaa   :  { %v961_v25 = vmul.f32 %v950_v23, %v927_v22 }
 0xaab   :  { %v965_v26 = vmul.f32 %v1330_v18, %v962_v21 }
 0xaac   :  { %v964_v27 = vmul.f32 %v1330_v18, %v961_v25 }
 0xaad   :  { %v968_v29 = vadd.f32 %v1331_v51, %v965_v26 }
 0xaae   :  { %v967_v30 = vadd.f32 %v1331_v51, %v964_v27  ;;  %v1334_v51 = vld [vmem:[%s1789_s7 + $0x8] ss:$0 sm:$0xff] }
 0xab0   :  { %v969_v31 = vpack.c.bf16 %v968_v29, %v967_v30 }
 0xab2   :  { %1252 = vmatmul.msk.bf16.vlgmr.msrb.gmra.mxu2 %vm182_vm1, %v969_v31  ;;  %vm1105_vm1 = vcmask 1040384  }
 0xb35   :  { %v999_v42 = vpop.f32.mrf.mxu2 }
 0xb36   :  { %v1000_v43 = vadd.f32 %v1332_v41, %v999_v42 }
 0xb38   :  { %v1006_v44 = vmul.f32 0.044715, %v1000_v43  ;;  %v1004_v22 = vmul.f32 0.5, %v1000_v43 }
 0xb3a   :  { %v1008_v46 = vmul.f32 %v1006_v44, %v1000_v43 }
 0xb3c   :  { %v1010_v47 = vmul.f32 %v1008_v46, %v1000_v43 }
 0xb3d   :  { %v1001_v48 = vpop.f32.mrf.mxu2 }
 0xb3e   :  { %v1012_v50 = vadd.f32 %v1010_v47, %v1000_v43  ;;  %v1002_v52 = vadd.f32 %v1332_v41, %v1001_v48 }
 0xb40   :  { %v1007_v54 = vmul.f32 0.044715, %v1002_v52  ;;  %v1014_v55 = vmul.f32 0.7978846, %v1012_v50  ;;  %v1005_v63 = vmul.f32 0.5, %v1002_v52 }
 0xb42   :  { %v1009_v45 = vmul.f32 %v1007_v54, %v1002_v52  ;;  %1378 = vtanh.f32 %v1014_v55 }
 0xb44   :  { %v1011_v59 = vmul.f32 %v1009_v45, %v1002_v52 }
 0xb46   :  { %v1013_v60 = vadd.f32 %v1011_v59, %v1002_v52 }
 0xb48   :  { %v1015_v61 = vmul.f32 0.7978846, %v1013_v60  ;;  %v1379_v62 = vpop.eup %1378 }
 0xb49   :  { %v1018_v57 = vadd.f32 1.0, %v1379_v62 }
 0xb4a   :  { %1380 = vtanh.f32 %v1015_v61 }
 0xb4b   :  { %v1020_v1 = vmul.f32 %v1018_v57, %v1004_v22 }
 0xb50   :  { %v1381_v28 = vpop.eup %1380 }
 0xb51   :  { %v1019_v0 = vadd.f32 1.0, %v1381_v28 }
 0xb53   :  { %v1021_v3 = vmul.f32 %v1019_v0, %v1005_v63 }
 0xb55   :  { %v1022_v2 = vpack.c.bf16 %v1021_v3, %v1020_v1 }
 0xb57   :  { %1096 = vmatmul.bf16.vlgmr.msra.gmra.mxu3 %v1022_v2 }
 0xbda   :  { %v1097_v49 = vpop.f32.mrf.mxu3 }
 0xbdb   :  { %v1098_v53 = vadd.f32 %v1333_v4, %v1097_v49 }
 0xbdd   :  { %v1101_v58 = vadd.f32 %v1098_v53, %v1712_v56 }
 0xbdf   :  { %v1103_v5 = vrot.slane %v1101_v58, 4 }
 0xbe1   :  { %v1106_v6 = vsel %vm1105_vm1, %v1101_v58, %v1103_v5 }
 0xbe2   :  { %v1099_v7 = vpop.f32.mrf.mxu3  ;;  %v1107_v8 = vsel %vm186_vm2, %v1106_v6, 0.0 }
 0xbe3   :  { %1108 = vadd.xlane.f32.xlu1 %v1107_v8 }
 0xc56   :  { %v1109_v9 = vpop.xlane.xlu1 %1108 }
 0xc57   :  { %v1110_v10 = vmul.f32 %v1109_v9, %v1531_v36 }
 0xc59   :  { %v1111_v11 = vsub.f32 %v1106_v6, %v1110_v10 }
 0xc5b   :  { %v1112_v24 = vmul.f32 %v1111_v11, %v1111_v11 }
 0xc5d   :  { %v1113_v12 = vsel %vm186_vm2, %v1112_v24, 0.0 }
 0xc5e   :  { %1114 = vadd.xlane.f32.xlu1 %v1113_v12 }
 0xcd1   :  { %v1115_v13 = vpop.xlane.xlu1 %1114 }
 0xcd2   :  { %v1116_v14 = vmul.f32 %v1115_v13, %v1531_v36  ;;  %v1335_v36 = vld [vmem:[%s1789_s7 + $0x9] ss:$0 sm:$0xff] }
 0xcd4   :  { %v1117_v15 = vadd.f32 1e-06, %v1116_v14 }
 0xcd6   :  { %1382 = vrsqrt.f32 %v1117_v15  ;;  %vm1124_vm12 = vweird.f32 %v1117_v15 }
 0xcdc   :  { %v1383_v56 = vpop.eup %1382 }
 0xcdd   :  { %v1119_v16 = vmul.f32 %v1383_v56, %v1117_v15  ;;  %vm1125_vm11 = vweird.f32 %v1383_v56 }
 0xcde   :  { %vm1126_vm13 = vmor %vm1124_vm12, %vm1125_vm11 }
 0xcdf   :  { %v1120_v17 = vmul.f32 %v1383_v56, %v1119_v16 }
 0xce1   :  { %v1121_v18 = vmul.f32 0.5, %v1120_v17 }
 0xce3   :  { %v1122_v19 = vsub.f32 1.5, %v1121_v18 }
 0xce5   :  { %v1123_v20 = vmul.f32 %v1383_v56, %v1122_v19 }
 0xce7   :  { %v1127_v21 = vsel %vm1126_vm13, %v1383_v56, %v1123_v20 }
 0xce8   :  { %v1128_v23 = vmul.f32 %v1127_v21, %v1111_v11 }
 0xcea   :  { %v1130_v25 = vmul.f32 %v1334_v51, %v1128_v23 }
 0xcec   :  { %v1132_v26 = vadd.f32 %v1335_v36, %v1130_v25 }
 0xcee   :  { %1133 = vst.msk [vmem:[#allocation3] sm:$0x3] %vm186_vm2, %v1132_v26 }
 0xcef   :  { %1144 = dma.vmem_to_hbm [thread:$0]  %s1140_s5, 32, %s1142_s25, [#allocation4]  }
 0xcf0   :  { %1408 = dma.done.wait [#allocation4], 32  }
 0xcf1   :  { %1409 = vsyncadd [#allocation4], 4294967264 }
 0xcf2   :  { %1149 = vsyncpa [#allocation4], 1 }

</bundles_post_ra>
